<compile_context>
chip_gen: v7x
topology: tpu7x:2x2x1
jax: 0.10.0
libtpu: 0.0.40
codegen_flags: <defaults>
</compile_context>

<pallas_src>
import jax
import jax.numpy as jnp
from jax.experimental import pallas as pl
from jax.experimental.pallas import tpu as pltpu


def _adaptive_windows(in_size, out_size):
    """PyTorch AdaptiveMaxPool window boundaries: [floor(i*L/p), ceil((i+1)*L/p))."""
    wins = []
    for i in range(out_size):
        start = (i * in_size) // out_size
        end = -((-(i + 1) * in_size) // out_size)  # ceil((i+1)*in/out)
        wins.append((start, end))
    return wins


def make_spp(pyramids, N, C, H, W, dtype):
    pyramids = list(pyramids)
    total = C * sum(p * p for p in pyramids)

    def spp_kernel(x_ref, o_ref):
        x = x_ref[...]                      # (1, C, H, W) -- one batch row
        nb = x.shape[0]

        # ---- Pool each unique level. Finest first so coarser levels can be
        #      derived from already-pooled results when windows nest exactly.
        pooled = {}                         # p -> (nb, C, p, p)
        prev = None
        for p in sorted(set(pyramids), reverse=True):
            if (prev is not None and H % prev == 0 and W % prev == 0
                    and prev % p == 0):
                # Coarser level = max over r x r groups of the finer level.
                r = prev // p
                src = pooled[prev].reshape(nb, C, p, r, p, r)
                pooled[p] = jnp.max(jnp.max(src, axis=5), axis=3)
            elif H % p == 0 and W % p == 0:
                # Uniform windows: single reshape + two single-axis reductions.
                x6 = x.reshape(nb, C, p, H // p, p, W // p)
                pooled[p] = jnp.max(jnp.max(x6, axis=5), axis=3)
            else:
                # Ragged fallback: exact AdaptiveMaxPool2d window arithmetic.
                cells = []
                for (hs, he) in _adaptive_windows(H, p):
                    for (ws, we) in _adaptive_windows(W, p):
                        win = x[:, :, hs:he, ws:we]
                        cells.append(jnp.max(jnp.max(win, axis=3), axis=2))
                pooled[p] = jnp.stack(cells, axis=-1).reshape(nb, C, p, p)
            prev = p

        # ---- Write each level directly into the output at its static column
        #      offset (no stack/concat temps). reshape of (nb, C, p, p) gives
        #      the channel-major c*p*p + i*p + j ordering of
        #      torch.flatten(pool(x), 1).
        off = 0
        for p in pyramids:
            width = C * p * p
            o_ref[:, :, off:off + width] = (
                pooled[p].reshape(nb, 1, width).astype(o_ref.dtype))
            off += width

    # For production shapes (large C), additionally tile over C so the per-step
    # block stays a few MiB (v7x has only 64 MiB physical VMEM). Not needed at
    # this toy size.
    call = pl.pallas_call(
        spp_kernel,
        grid=(N,),
        in_specs=[pl.BlockSpec((1, C, H, W), lambda n: (n, 0, 0, 0))],
        out_specs=pl.BlockSpec((1, 1, total), lambda n: (n, 0, 0)),
        out_shape=jax.ShapeDtypeStruct((N, 1, total), dtype),
        compiler_params=pltpu.CompilerParams(
            dimension_semantics=("parallel",),
            vmem_limit_bytes=32 * 1024 * 1024),
    )

    def spp(x):
        return call(x).reshape(N, total)

    return spp


def spp_reference(x, pyramids):
    """Pure-JAX reference mirroring PyTorch SPP semantics."""
    N, C, H, W = x.shape
    outs = []
    for p in pyramids:
        h_wins = _adaptive_windows(H, p)
        w_wins = _adaptive_windows(W, p)
        cells = []
        for (hs, he) in h_wins:
            for (ws, we) in w_wins:
                cells.append(jnp.max(x[:, :, hs:he, ws:we], axis=(2, 3)))
        pooled = jnp.stack(cells, axis=-1)  # (N, C, p*p)
        outs.append(pooled.reshape(N, C * p * p))
    return jnp.concatenate(outs, axis=1)


if __name__ == "__main__":
    key = jax.random.PRNGKey(0)
    N, C, H, W = 2, 4, 16, 16
    pyramids = [1, 2, 4]  # SPP([1, 2, 4]) -> (N, C * (1 + 4 + 16)) = (2, 84)

    x = jax.random.normal(key, (N, C, H, W), dtype=jnp.float32)

    spp = make_spp(pyramids, N, C, H, W, x.dtype)
    out = spp(x)
    jax.block_until_ready(out)

    ref = spp_reference(x, pyramids)
    assert out.shape == (N, C * sum(p * p for p in pyramids)), out.shape
    assert jnp.allclose(out, ref), "Pallas SPP output mismatch vs reference"

    print("KERNEL_OK")
</pallas_src>

<mosaic_0001>
module attributes {stable_mosaic.version = 11 : i64} {
  func.func @spp_kernel(%arg0: i32, %arg1: memref<1x4x16x16xf32, #tpu.memory_space<vmem>>, %arg2: memref<1x1x84xf32, #tpu.memory_space<vmem>>) attributes {dimension_semantics = [#tpu.dimension_semantics<parallel>], iteration_bounds = array<i64: 2>, scalar_prefetch = 0 : i64, scratch_operands = 0 : i64, tpu.core_type = #tpu.core_type<tc>, window_params = [{transform_indices = @transform_0, window_bounds = array<i64: 1, 4, 16, 16>}, {transform_indices = @transform_1, window_bounds = array<i64: 1, 1, 84>}]} {
    %c0 = arith.constant 0 : index
    %c0_0 = arith.constant 0 : index
    %c0_1 = arith.constant 0 : index
    %c0_2 = arith.constant 0 : index
    %0 = vector.load %arg1[%c0, %c0_0, %c0_1, %c0_2] : memref<1x4x16x16xf32, #tpu.memory_space<vmem>>, vector<1x4x16x16xf32>
    %1 = vector.shape_cast %0 : vector<1x4x16x16xf32> to vector<1x4x4x4x4x4xf32>
    %cst = arith.constant dense<0xFF800000> : vector<1x4x4x4x4xf32>
    %2 = vector.multi_reduction <maximumf>, %1, %cst [5] : vector<1x4x4x4x4x4xf32> to vector<1x4x4x4x4xf32>
    %cst_3 = arith.constant dense<0xFF800000> : vector<1x4x4x4xf32>
    %3 = vector.multi_reduction <maximumf>, %2, %cst_3 [3] : vector<1x4x4x4x4xf32> to vector<1x4x4x4xf32>
    %4 = vector.shape_cast %3 : vector<1x4x4x4xf32> to vector<1x4x2x2x2x2xf32>
    %cst_4 = arith.constant dense<0xFF800000> : vector<1x4x2x2x2xf32>
    %5 = vector.multi_reduction <maximumf>, %4, %cst_4 [5] : vector<1x4x2x2x2x2xf32> to vector<1x4x2x2x2xf32>
    %cst_5 = arith.constant dense<0xFF800000> : vector<1x4x2x2xf32>
    %6 = vector.multi_reduction <maximumf>, %5, %cst_5 [3] : vector<1x4x2x2x2xf32> to vector<1x4x2x2xf32>
    %7 = vector.shape_cast %6 : vector<1x4x2x2xf32> to vector<1x4x1x2x1x2xf32>
    %cst_6 = arith.constant dense<0xFF800000> : vector<1x4x1x2x1xf32>
    %8 = vector.multi_reduction <maximumf>, %7, %cst_6 [5] : vector<1x4x1x2x1x2xf32> to vector<1x4x1x2x1xf32>
    %cst_7 = arith.constant dense<0xFF800000> : vector<1x4x1x1xf32>
    %9 = vector.multi_reduction <maximumf>, %8, %cst_7 [3] : vector<1x4x1x2x1xf32> to vector<1x4x1x1xf32>
    %10 = vector.shape_cast %9 : vector<1x4x1x1xf32> to vector<1x1x4xf32>
    %c0_8 = arith.constant 0 : index
    %c0_9 = arith.constant 0 : index
    %c0_10 = arith.constant 0 : index
    %11 = vector.load %arg2[%c0_8, %c0_9, %c0_10] : memref<1x1x84xf32, #tpu.memory_space<vmem>>, vector<1x1x4xf32>
    tpu.vector_store %arg2[%c0_8, %c0_9, %c0_10], %10 {strides = array<i32>} : memref<1x1x84xf32, #tpu.memory_space<vmem>>, vector<1x1x4xf32>,
    %12 = vector.shape_cast %6 : vector<1x4x2x2xf32> to vector<1x1x16xf32>
    %c0_11 = arith.constant 0 : index
    %c0_12 = arith.constant 0 : index
    %c4 = arith.constant 4 : index
    %13 = vector.load %arg2[%c0_11, %c0_12, %c4] : memref<1x1x84xf32, #tpu.memory_space<vmem>>, vector<1x1x16xf32>
    tpu.vector_store %arg2[%c0_11, %c0_12, %c4], %12 {strides = array<i32>} : memref<1x1x84xf32, #tpu.memory_space<vmem>>, vector<1x1x16xf32>,
    %14 = vector.shape_cast %3 : vector<1x4x4x4xf32> to vector<1x1x64xf32>
    %c0_13 = arith.constant 0 : index
    %c0_14 = arith.constant 0 : index
    %c20 = arith.constant 20 : index
    %15 = vector.load %arg2[%c0_13, %c0_14, %c20] : memref<1x1x84xf32, #tpu.memory_space<vmem>>, vector<1x1x64xf32>
    tpu.vector_store %arg2[%c0_13, %c0_14, %c20], %14 {strides = array<i32>} : memref<1x1x84xf32, #tpu.memory_space<vmem>>, vector<1x1x64xf32>,
    return
  }
  func.func @transform_0(%arg0: i32) -> (i32, i32, i32, i32) {
    %c0_i32 = arith.constant 0 : i32
    %c0_i32_0 = arith.constant 0 : i32
    %c0_i32_1 = arith.constant 0 : i32
    %c0_i32_2 = arith.constant 0 : i32
    return %arg0, %c0_i32, %c0_i32_0, %c0_i32_1 : i32, i32, i32, i32
  }
  func.func @transform_1(%arg0: i32) -> (i32, i32, i32) {
    %c0_i32 = arith.constant 0 : i32
    %c0_i32_0 = arith.constant 0 : i32
    %c0_i32_1 = arith.constant 0 : i32
    return %arg0, %c0_i32, %c0_i32_0 : i32, i32, i32
  }
}

</mosaic_0001>

<bundles_post_ra>
// kernel: tpu_custom_call.1
= control target key start
LH: loop header
LB: loop body
LE: loop exit
PB: predicated region body
PF: predicated region fallthrough
CT: control target
= control target key end

     0   :  { %6 = vsyncpa [#allocation3], 0  ;;  %s2933_s0 = inlined_call_operand.hbm [shape: f32[2,4,16,16], index: 0, kind: input, shape index: {}]   ;;  %s2934_s1 = inlined_call_operand.hbm [shape: f32[2,1,84], index: 1, kind: output, shape index: {}]  }
   0x1   :  { %8 = vsyncpa [#allocation3 + $0x1], 0 }
   0x2   :  { %9 = vsyncpa [#allocation4], 0 }
   0x3   :  { %11 = vsyncpa [#allocation4 + $0x1], 0  ;;  %s2060_s6 = smov 0   ;;  %s2062_s7 = smov 0  }
   0x4   :  { %s2064_s8 = smov 0   ;;  %s2066_s9 = smov 0  }
   0x5 LB: > { %s2081_s10 = sadd.s32 4294967295, %s2037_s9   ;;  %s1872_s11 = sadd.s32 4294967294, %s2037_s9   ;;  %s2037_s9 = sphi %s2066_s9, %s2947_s9   ;;  %s2033_s8 = sphi %s2064_s8, %s2946_s8   ;;  %s2029_s7 = sphi %s2062_s7, %s2945_s7   ;;  %s2025_s6 = sphi %s2060_s6, %s2944_s6  }
   0x6   : > { %s2085_s12 = sadd.s32 1, %s2037_s9   ;;  %s24_s13 = sadd.s32 1, %s2033_s8 }
   0x7   : > { %s21_s14 = ssub.s32 %s2037_s9, %s2085_s12  ;;  %p31_p0 = scmp.ne.s32.totalorder %s2033_s8, %s2029_s7 }
   0x8   : > { %p22_p1 = scmp.eq.s32.totalorder %s21_s14, 0  ;;  %p32_p2 = scmp.eq.s32.totalorder %s2037_s9, 0 }
   0x9   : > { %p37_p3 = scmp.ne.s32.totalorder %s2029_s7, %s2025_s6  ;;  %p38_p4 = scmp.eq.s32.totalorder %s2081_s10, 0 }
   0xa   : > { %s2097_s15 = scalar_select %p22_p1, %s2033_s8, %s24_s13  }
   0xb   : > { %p2099_p5 = por %p32_p2, %p31_p0  ;;  %p2103_p6 = por %p38_p4, %p37_p3 }
   0xc   : > { %p61_p7 = scmp.eq.s32.totalorder %s2081_s10, 1  ;;  %p67_p8 = scmp.eq.s32.totalorder %s1872_s11, 1 }
   0xd   : > { %p1896_p10 = scmp.lt.s32.totalorder %s2037_s9, 2  ;;  %s87_s20 = sand.u32 1, %s2033_s8  }
   0xe   : > { %p2110_p11 = por %p61_p7, %p31_p0  ;;  %p2114_p12 = por %p67_p8, %p37_p3 }
   0xf   : > { %s1883_s21 = sshll.u32 %s2037_s9, 10  ;;  %s1875_s22 = sshll.u32 %s87_s20, 6 }
  0x10   : > { %s2938_s18 = scalar_select %p2110_p11, 1, 0 }
  0x11   : > { %s2939_s19 = scalar_select %p2114_p12, 1, 0 }
  0x12   : > { %s2123_s25 = scalar_lea.hbm %s2933_s0, %s1883_s21  ;;  %s91_s26 = scalar_lea.vmem [#allocation2], %s1875_s22 }
  0x13   : > { %s98_s27 = sshll.u32 %s91_s26, 4  ;;  %p2127_p13 = pnand %p1896_p10, %p2099_p5  ;;  %s2131_s27 = int_to_ptr.vmem [resolvable:$true] %s98_s27 }
  0x14   : > { %s2133_s29 = scalar_lea.sflag [#allocation3], %s87_s20  ;;  %s1941_s30 = scalar_lea.hbm %s2123_s25, 1024 }
  0x15   : > { %p1942_p0 = scmp.ne.s32.totalorder %s2123_s25, %s1941_s30  ;;  %p1943_p1 = pneg %p2127_p13 }
  0x16   : > { %s1946_s4 = scalar_lea.hbm %s2933_s0, 2048  ;;  %p1947_p4 = scmp.lt.u32.totalorder %s2123_s25, %s2933_s0 }
  0x17   : > { %p1944_p2 = pnand %p1943_p1, %p1942_p0  ;;  %p1948_p5 = scmp.lt.u32.totalorder %s1946_s4, %s1941_s30 }
  0x18   : > { %p1950_p8 = scmp.lt.u32.totalorder %s1941_s30, %s2123_s25 }
  0x19   : > { %p1945_p3 = pneg %p1944_p2  ;;  %p1949_p7 = por %p1948_p5, %p1947_p4 }
  0x1b   : > { %p1951_p10 = por %p1950_p8, %p1949_p7 }
  0x1d   : > { %p1952_p9 = pnand %p1951_p10, %p1945_p3 }
  0x1f   : > { %1955 = shalt.err (!%p1952_p9)
}
  0x20   : > { %s1956_s13 = scalar_lea.vmem %s2131_s27, 1024  ;;  %s2039_s14 = smov [#allocation2]  }
  0x21   : > { %p1957_p0 = scmp.ne.s32.totalorder %s2131_s27, %s1956_s13  ;;  %s1961_s16 = sshll.u32 %s2039_s14, 4  ;;  %s1962_s16 = int_to_ptr.vmem [resolvable:$false] %s1961_s16 }
  0x22   : > { %s1963_s20 = scalar_lea.vmem %s1962_s16, 2048  ;;  %p1964_p11 = scmp.lt.s32.totalorder %s2131_s27, %s1962_s16 }
  0x23   : > { %p1959_p2 = pnand %p1957_p0, %p1943_p1  ;;  %p1965_p4 = scmp.lt.s32.totalorder %s1963_s20, %s1956_s13 }
  0x25   : > { %p1960_p12 = pneg %p1959_p2  ;;  %p1966_p5 = por %p1965_p4, %p1964_p11 }
  0x27   : > { %p1967_p7 = pnand %p1966_p5, %p1960_p12 }
  0x29   : > { %1970 = shalt.err (!%p1967_p7)
}
  0x2a   : > { %s2040_s21 = smov 128   ;;  %s2041_s22 = smov 8  }
  0x2b   : > { %1891 = dma.hbm_to_vmem [thread:$0]  (!%p2127_p13), %s2123_s25, 1024, %s2131_s27, %s2133_s29, %s2040_s21, %s2040_s21, %s2041_s22  }
  0x2c   : > { %p1878_p9 = scmp.ge.s32.totalorder %s2037_s9, 1  ;;  %p106_p1 = scmp.lt.s32.totalorder %s2037_s9, 3 }
  0x2e   : > { %p107_p3 = pnand %p1878_p9, %p106_p1 }
  0x2f   : > { %s2164_s23 = sand.u32 (!%p107_p3), 1, %s2029_s7  }
  0x30   : > { %110 = sbr.rel (%p107_p3) target bundleno = 988 (0x3dc), region = 24  ;;  %s1879_s24 = sshll.u32 (!%p107_p3), %s2164_s23, 6 }
  0x31   : > { %s113_s26 = scalar_lea.sflag (!%p107_p3), [#allocation3], %s2164_s23  ;;  %s116_s30 = scalar_lea.vmem (!%p107_p3), [#allocation2], %s1879_s24 }
  0x37   : > { %2016 = dma.done.wait (%p2103_p6), %s113_s26, 1024  }
  0x38   : > { %2018 = vsyncadd (%p2103_p6), %s113_s26, 4294966272  ;;  %v2172_v0 = vld [vmem:[%s116_s30 + $0x10] sm:$0xff]  ;;  %v2174_v1 = vld [vmem:[%s116_s30] sm:$0xff]  ;;  %s2042_s25 = smov 124   ;;  %s2043_s17 = smov 120   ;;  %v227_v22 = vlaneseq  ;;  %vm766_vm0 = vcmask 27648  }
  0x39   : > { %154 = vrot.lane.b32.xlu1 %v2172_v0, %s2042_s25  ;;  %150 = vrot.lane.b32.xlu0 %v2174_v1, %s2042_s25  ;;  %v2178_v2 = vld [vmem:[%s116_s30 + $0x18] sm:$0xff]  ;;  %v2180_v3 = vld [vmem:[%s116_s30 + $0x8] sm:$0xff]  ;;  %s2044_s27 = smov 116   ;;  %v2045_v20 = vmov 1983009808   ;;  %vm959_vm1 = vcmask 1043456  }
  0x3a   : > { %v2184_v4 = vld [vmem:[%s116_s30 + $0x28] sm:$0xff]  ;;  %v2186_v5 = vld [vmem:[%s116_s30 + $0x20] sm:$0xff]  ;;  %v2190_v6 = vld [vmem:[%s116_s30 + $0x38] sm:$0xff]  ;;  %v225_v21 = vunpack.c.l.s4 %v2045_v20  ;;  %v2233_v26 = vshrl.u32 %v227_v22, 7  ;;  %v2046_v29 = vmov 1934713408  }
  0x3b   : > { %v2192_v7 = vld [vmem:[%s116_s30 + $0x30] sm:$0xff]  ;;  %v257_v30 = vunpack.c.l.s4 %v2046_v29  ;;  %vm1330_vm2 = vcmask 1041409   ;;  %vm1332_vm3 = vcmask 1042434   ;;  %vm1334_vm4 = vcmask 1043459   ;;  %s2859_s28 = scalar_lea.vmem [#allocation5], %s2164_s23  ;;  %s1880_s29 = sshll.u32 %s2081_s10, 4 }
  0x3c   : > { %v226_v25 = vunpack.c.0.s8 %v225_v21  ;;  %vm1493_vm5 = vcmask 9216   ;;  %vm1542_vm6 = vcmask 1041408   ;;  %vm1639_vm7 = vcmask 24576   ;;  %s1806_s2 = sshll.u32 %s2859_s28, 4  ;;  %s2888_s5 = scalar_lea.hbm %s2934_s1, %s1880_s29  ;;  %s2890_s2 = int_to_ptr.vmem [resolvable:$true] %s1806_s2 }
  0x3d   : > { %156 = vrot.lane.b32.xlu1 %v2178_v2, %s2042_s25  ;;  %152 = vrot.lane.b32.xlu0 %v2180_v3, %s2042_s25  ;;  %v258_v35 = vunpack.c.0.s8 %v257_v30  ;;  %vm1746_vm8 = vcmask 294112   ;;  %vm1753_vm9 = vcmask 359712   ;;  %vm1760_vm10 = vcmask 425312   ;;  %s1794_s10 = scalar_lea.sflag [#allocation4], %s2164_s23  ;;  %s1971_s11 = scalar_lea.vmem %s2890_s2, 16 }
  0x3e   : > { %v2240_v31 = vsub.s32 %v226_v25, %v2233_v26  ;;  %vm1767_vm11 = vcmask 490912   ;;  %vm1699_vm12 = vcmask 162912   ;;  %vm1702_vm13 = vcmask 155680   ;;  %p1972_p6 = scmp.ne.s32.totalorder %s2890_s2, %s1971_s11  ;;  %p2941_p11 = scmp.ne.s32.totalorder %s2938_s18, 0 }
  0x3f   : > { %v2249_v44 = vsub.s32 %v258_v35, %v2233_v26  ;;  %vm1774_vm14 = vcmask 556512   ;;  %vm1781_vm15 = vcmask 622112   ;;  %s2049_s13 = smov [#allocation5]  }
  0x40   : > { %p1973_p12 = pnand %p1972_p6, %p2941_p11  ;;  %s1975_s14 = sshll.u32 %s2049_s13, 4  ;;  %s1976_s14 = int_to_ptr.vmem [resolvable:$false] %s1975_s14 }
  0x41   : > { %160 = vrot.lane.b32.xlu1 %v2184_v4, %s2042_s25  ;;  %158 = vrot.lane.b32.xlu0 %v2186_v5, %s2042_s25  ;;  %s1977_s16 = scalar_lea.vmem %s1976_s14, 32  ;;  %p1978_p8 = scmp.lt.s32.totalorder %s2890_s2, %s1976_s14 }
  0x42   : > { %p1974_p13 = pneg %p1973_p12  ;;  %p1979_p10 = scmp.lt.s32.totalorder %s1977_s16, %s1971_s11 }
  0x44   : > { %p1980_p0 = por %p1979_p10, %p1978_p8 }
  0x45   : > { %164 = vrot.lane.b32.xlu1 %v2190_v6, %s2042_s25  ;;  %162 = vrot.lane.b32.xlu0 %v2192_v7, %s2042_s25 }
  0x46   : > { %p1981_p2 = pnand %p1980_p0, %p1974_p13 }
  0x49   : > { %176 = vrot.lane.b32.xlu1 %v2180_v3, %s2043_s17  ;;  %174 = vrot.lane.b32.xlu0 %v2174_v1, %s2043_s17 }
  0x4d   : > { %180 = vrot.lane.b32.xlu1 %v2178_v2, %s2043_s17  ;;  %178 = vrot.lane.b32.xlu0 %v2172_v0, %s2043_s17 }
  0x51   : > { %184 = vrot.lane.b32.xlu1 %v2184_v4, %s2043_s17  ;;  %182 = vrot.lane.b32.xlu0 %v2186_v5, %s2043_s17 }
  0x55   : > { %188 = vrot.lane.b32.xlu1 %v2190_v6, %s2043_s17  ;;  %186 = vrot.lane.b32.xlu0 %v2192_v7, %s2043_s17 }
  0x59   : > { %200 = vrot.lane.b32.xlu1 %v2180_v3, %s2044_s27  ;;  %198 = vrot.lane.b32.xlu0 %v2174_v1, %s2044_s27 }
  0x5d   : > { %204 = vrot.lane.b32.xlu1 %v2178_v2, %s2044_s27  ;;  %202 = vrot.lane.b32.xlu0 %v2172_v0, %s2044_s27 }
  0x61   : > { %208 = vrot.lane.b32.xlu1 %v2184_v4, %s2044_s27  ;;  %206 = vrot.lane.b32.xlu0 %v2186_v5, %s2044_s27 }
  0x65   : > { %212 = vrot.lane.b32.xlu1 %v2190_v6, %s2044_s27  ;;  %210 = vrot.lane.b32.xlu0 %v2192_v7, %s2044_s27 }
  0xab   : > { %v2212_v8 = vpop.permute.xlu1 %154  ;;  %v151_v9 = vpop.permute.xlu0 %150 }
  0xaf   : > { %v2214_v10 = vpop.permute.xlu1 %156  ;;  %v153_v11 = vpop.permute.xlu0 %152 }
  0xb3   : > { %v2216_v12 = vpop.permute.xlu1 %160  ;;  %v2218_v13 = vpop.permute.xlu0 %158 }
  0xb7   : > { %v2220_v14 = vpop.permute.xlu1 %164  ;;  %v2222_v15 = vpop.permute.xlu0 %162 }
  0xbb   : > { %v177_v16 = vpop.permute.xlu1 %176  ;;  %v175_v17 = vpop.permute.xlu0 %174 }
  0xbc   : > { %v222_v32 = vcombine.low %v2174_v1, %v175_v17  ;;  %v223_v33 = vcombine.high %v2174_v1, %v175_v17  ;;  %v290_v45 = vcombine.low %v2180_v3, %v177_v16  ;;  %v291_v59 = vcombine.high %v2180_v3, %v177_v16 }
  0xbd   : > { %v2047_v17 = vmov 0.0  }
  0xbe   : > { %v230_v41 = vrot.slane %v222_v32, %v2240_v31  ;;  %v237_v42 = vrot.slane %v223_v33, %v2240_v31  ;;  %v298_v53 = vrot.slane %v290_v45, %v2240_v31  ;;  %v305_v21 = vrot.slane %v291_v59, %v2240_v31 }
  0xbf   : > { %v2224_v18 = vpop.permute.xlu1 %180  ;;  %v2226_v19 = vpop.permute.xlu0 %178 }
  0xc0   : > { %v358_v33 = vcombine.low %v2172_v0, %v2226_v19 }
  0xc3   : > { %v2228_v23 = vpop.permute.xlu1 %184  ;;  %v2230_v24 = vpop.permute.xlu0 %182 }
  0xc7   : > { %v2235_v27 = vpop.permute.xlu1 %188  ;;  %v2237_v28 = vpop.permute.xlu0 %186 }
  0xcb   : > { %v199_v34 = vpop.permute.xlu0 %198  ;;  %v201_v36 = vpop.permute.xlu1 %200 }
  0xcc   : > { %v238_v37 = vcombine.low %v151_v9, %v199_v34  ;;  %v239_v38 = vcombine.high %v151_v9, %v199_v34  ;;  %v306_v43 = vcombine.low %v153_v11, %v201_v36  ;;  %v307_v54 = vcombine.high %v153_v11, %v201_v36 }
  0xce   : > { %v246_v39 = vrot.slane %v238_v37, %v2240_v31  ;;  %v253_v40 = vrot.slane %v239_v38, %v2240_v31  ;;  %v314_v50 = vrot.slane %v306_v43, %v2240_v31  ;;  %v321_v61 = vrot.slane %v307_v54, %v2240_v31 }
  0xcf   : > { %v203_v9 = vpop.permute.xlu0 %202 }
  0xd0   : > { %v270_v46 = vcombine.low %v237_v42, %v253_v40  ;;  %v254_v47 = vcombine.low %v230_v41, %v246_v39  ;;  %v271_v48 = vcombine.high %v237_v42, %v253_v40  ;;  %v255_v49 = vcombine.high %v230_v41, %v246_v39 }
  0xd1   : > { %v322_v60 = vcombine.low %v298_v53, %v314_v50  ;;  %v323_v1 = vcombine.high %v298_v53, %v314_v50  ;;  %v374_v3 = vcombine.low %v2212_v8, %v203_v9  ;;  %v338_v29 = vcombine.low %v305_v21, %v321_v61  ;;  %v205_v53 = vpop.permute.xlu1 %204 }
  0xd2   : > { %v278_v51 = vrot.slane %v270_v46, %v2249_v44  ;;  %v2255_v52 = vrot.slane %v254_v47, %v2249_v44  ;;  %v285_v57 = vrot.slane %v271_v48, %v2249_v44  ;;  %v269_v58 = vrot.slane %v255_v49, %v2249_v44 }
  0xd3   : > { %v330_v63 = vrot.slane %v322_v60, %v2249_v44  ;;  %v337_v25 = vrot.slane %v323_v1, %v2249_v44  ;;  %v382_v34 = vrot.slane %v374_v3, %v2240_v31  ;;  %v346_v36 = vrot.slane %v338_v29, %v2249_v44 }
  0xd4   : > { %v779_v55 = vsel %vm766_vm0, %v278_v51, -inf  ;;  %v767_v56 = vsel %vm766_vm0, %v2255_v52, -inf  ;;  %v785_v62 = vsel %vm766_vm0, %v285_v57, -inf  ;;  %v773_v11 = vsel %vm766_vm0, %v269_v58, -inf }
  0xd5   : > { %780 = vmax.xlane.f32.xlu1 %v779_v55  ;;  %768 = vmax.xlane.f32.xlu0 %v767_v56  ;;  %v287_v20 = vcombine.high %v269_v58, %v2047_v17  ;;  %v791_v16 = vsel %vm766_vm0, %v330_v63, -inf  ;;  %v288_v32 = vcombine.high %v278_v51, %v2047_v17  ;;  %v797_v35 = vsel %vm766_vm0, %v337_v25, -inf }
  0xd6   : > { %v339_v37 = vcombine.high %v305_v21, %v321_v61  ;;  %v289_v39 = vcombine.high %v285_v57, %v2047_v17  ;;  %v366_v40 = vrot.slane %v358_v33, %v2240_v31  ;;  %v375_v41 = vcombine.high %v2212_v8, %v203_v9 }
  0xd7   : > { %v776_v30 = vsel %vm766_vm0, %v287_v20, -inf  ;;  %v782_v38 = vsel %vm766_vm0, %v288_v32, -inf  ;;  %v803_v42 = vsel %vm766_vm0, %v346_v36, -inf  ;;  %v354_v47 = vcombine.high %v330_v63, %v2047_v17 }
  0xd8   : > { %v353_v43 = vrot.slane %v339_v37, %v2249_v44  ;;  %v390_v45 = vcombine.low %v366_v40, %v382_v34  ;;  %v788_v46 = vsel %vm766_vm0, %v289_v39, -inf  ;;  %v359_v48 = vcombine.high %v2172_v0, %v2226_v19 }
  0xd9   : > { %786 = vmax.xlane.f32.xlu1 %v785_v62  ;;  %774 = vmax.xlane.f32.xlu0 %v773_v11  ;;  %v389_v49 = vrot.slane %v375_v41, %v2240_v31  ;;  %v391_v51 = vcombine.high %v366_v40, %v382_v34  ;;  %v794_v54 = vsel %vm766_vm0, %v354_v47, -inf  ;;  %v355_v55 = vcombine.high %v337_v25, %v2047_v17 }
  0xda   : > { %v809_v50 = vsel %vm766_vm0, %v353_v43, -inf  ;;  %v398_v8 = vrot.slane %v390_v45, %v2249_v44  ;;  %v373_v56 = vrot.slane %v359_v48, %v2240_v31  ;;  %v442_v57 = vcombine.low %v2214_v10, %v205_v53 }
  0xdb   : > { %v405_v19 = vrot.slane %v391_v51, %v2249_v44  ;;  %v800_v59 = vsel %vm766_vm0, %v355_v55, -inf  ;;  %v356_v60 = vcombine.high %v346_v36, %v2047_v17  ;;  %v426_v61 = vcombine.low %v2178_v2, %v2224_v18 }
  0xdc   : > { %v815_v0 = vsel %vm766_vm0, %v398_v8, -inf  ;;  %v406_v58 = vcombine.low %v373_v56, %v389_v49  ;;  %v450_v62 = vrot.slane %v442_v57, %v2240_v31  ;;  %v407_v9 = vcombine.high %v373_v56, %v389_v49 }
  0xdd   : > { %792 = vmax.xlane.f32.xlu1 %v791_v16  ;;  %777 = vmax.xlane.f32.xlu0 %v776_v30  ;;  %v821_v63 = vsel %vm766_vm0, %v405_v19, -inf  ;;  %v806_v11 = vsel %vm766_vm0, %v356_v60, -inf  ;;  %v357_v20 = vcombine.high %v353_v43, %v2047_v17  ;;  %v434_v21 = vrot.slane %v426_v61, %v2240_v31 }
  0xde   : > { %v414_v1 = vrot.slane %v406_v58, %v2249_v44  ;;  %v443_v3 = vcombine.high %v2214_v10, %v205_v53  ;;  %v421_v25 = vrot.slane %v407_v9, %v2249_v44  ;;  %v422_v32 = vcombine.high %v398_v8, %v2047_v17  ;;  %v209_v9 = vpop.permute.xlu1 %208 }
  0xdf   : > { %v458_v29 = vcombine.low %v434_v21, %v450_v62  ;;  %v812_v30 = vsel %vm766_vm0, %v357_v20, -inf  ;;  %v427_v33 = vcombine.high %v2178_v2, %v2224_v18  ;;  %v459_v36 = vcombine.high %v434_v21, %v450_v62 }
  0xe0   : > { %v827_v16 = vsel %vm766_vm0, %v414_v1, -inf  ;;  %v457_v34 = vrot.slane %v443_v3, %v2240_v31  ;;  %v818_v37 = vsel %vm766_vm0, %v422_v32, -inf  ;;  %v2048_v41 = vmov 0  }
  0xe1   : > { %798 = vmax.xlane.f32.xlu1 %v797_v35  ;;  %783 = vmax.xlane.f32.xlu0 %v782_v38  ;;  %v833_v35 = vsel %vm766_vm0, %v421_v25, -inf  ;;  %v466_v10 = vrot.slane %v458_v29, %v2249_v44  ;;  %v423_v38 = vcombine.high %v405_v19, %v2047_v17  ;;  %v441_v39 = vrot.slane %v427_v33, %v2240_v31 }
  0xe2   : > { %v473_v2 = vrot.slane %v459_v36, %v2249_v44  ;;  %1940 = vset.pattern.permute.xlu0 %v2048_v41  ;;  %1939 = vset.pattern.permute.xlu1 %v2048_v41  ;;  %v424_v45 = vcombine.high %v414_v1, %v2047_v17  ;;  %v494_v8 = vcombine.low %v2186_v5, %v2230_v24  ;;  %v213_v36 = vpop.permute.xlu1 %212 }
  0xe3   : > { %v839_v40 = vsel %vm766_vm0, %v466_v10, -inf  ;;  %v474_v18 = vcombine.low %v441_v39, %v457_v34  ;;  %v824_v43 = vsel %vm766_vm0, %v423_v38, -inf  ;;  %v286_v55 = vcombine.high %v2255_v52, %v2047_v17 }
  0xe4   : > { %v845_v47 = vsel %vm766_vm0, %v473_v2, -inf  ;;  %v830_v49 = vsel %vm766_vm0, %v424_v45, -inf  ;;  %v475_v56 = vcombine.high %v441_v39, %v457_v34  ;;  %v490_v19 = vcombine.high %v466_v10, %v2047_v17 }
  0xe5   : > { %804 = vmax.xlane.f32.xlu1 %v803_v42  ;;  %789 = vmax.xlane.f32.xlu0 %v788_v46  ;;  %v207_v42 = vpop.permute.xlu0 %206  ;;  %v482_v48 = vrot.slane %v474_v18, %v2249_v44  ;;  %v495_v58 = vcombine.high %v2186_v5, %v2230_v24  ;;  %v770_v52 = vsel %vm766_vm0, %v286_v55, -inf  ;;  %v491_v5 = vcombine.high %v473_v2, %v2047_v17 }
  0xe6   : > { %v510_v46 = vcombine.low %v2218_v13, %v207_v42  ;;  %v511_v51 = vcombine.high %v2218_v13, %v207_v42  ;;  %v2345_v13 = vrot.slane %v494_v8, %v2240_v31  ;;  %v489_v61 = vrot.slane %v475_v56, %v2249_v44 }
  0xe7   : > { %v2358_v24 = vrot.slane %v495_v58, %v2240_v31  ;;  %v630_v1 = vcombine.low %v2192_v7, %v2237_v28  ;;  %v492_v29 = vcombine.high %v482_v48, %v2047_v17  ;;  %v578_v32 = vcombine.low %v2216_v12, %v209_v9 }
  0xe8   : > { %v2335_v53 = vrot.slane %v510_v46, %v2240_v31  ;;  %v857_v21 = vsel %vm766_vm0, %v489_v61, -inf  ;;  %v698_v46 = vcombine.low %v2190_v6, %v2235_v27  ;;  %v579_v55 = vcombine.high %v2216_v12, %v209_v9 }
  0xe9   : > { %810 = vmax.xlane.f32.xlu1 %v809_v50  ;;  %795 = vmax.xlane.f32.xlu0 %v794_v54  ;;  %v425_v50 = vcombine.high %v421_v25, %v2047_v17  ;;  %v851_v54 = vsel %vm766_vm0, %v482_v48, -inf  ;;  %v211_v57 = vpop.permute.xlu0 %210  ;;  %v848_v25 = vsel %vm766_vm0, %v491_v5, -inf  ;;  %v2393_v39 = vrot.slane %v578_v32, %v2240_v31 }
  0xea   : > { %v646_v60 = vcombine.low %v2222_v15, %v211_v57  ;;  %v526_v62 = vcombine.low %v2345_v13, %v2335_v53 }
  0xec   : > { %v2364_v20 = vrot.slane %v646_v60, %v2240_v31  ;;  %v534_v3 = vrot.slane %v526_v62, %v2249_v44  ;;  %v563_v60 = vcombine.high %v2184_v4, %v2228_v23  ;;  %v527_v62 = vcombine.high %v2345_v13, %v2335_v53 }
  0xed   : > { %816 = vmax.xlane.f32.xlu1 %v815_v0  ;;  %801 = vmax.xlane.f32.xlu0 %v800_v59  ;;  %v836_v0 = vsel %vm766_vm0, %v425_v50, -inf  ;;  %v2348_v59 = vrot.slane %v511_v51, %v2240_v31  ;;  %v699_v13 = vcombine.high %v2190_v6, %v2235_v27 }
  0xee   : > { %v863_v34 = vsel %vm766_vm0, %v534_v3, -inf  ;;  %v541_v9 = vrot.slane %v527_v62, %v2249_v44 }
  0xef   : > { %v543_v32 = vcombine.high %v2358_v24, %v2348_v59  ;;  %v713_v6 = vrot.slane %v699_v13, %v2240_v31 }
  0xf1   : > { %822 = vmax.xlane.f32.xlu1 %v821_v63  ;;  %807 = vmax.xlane.f32.xlu0 %v806_v11  ;;  %v842_v63 = vsel %vm766_vm0, %v490_v19, -inf  ;;  %v647_v11 = vcombine.high %v2222_v15, %v211_v57  ;;  %v2375_v15 = vrot.slane %v630_v1, %v2240_v31  ;;  %v577_v1 = vrot.slane %v563_v60, %v2240_v31 }
  0xf3   : > { %v2379_v33 = vrot.slane %v647_v11, %v2240_v31  ;;  %v662_v10 = vcombine.low %v2375_v15, %v2364_v20 }
  0xf5   : > { %828 = vmax.xlane.f32.xlu1 %v827_v16  ;;  %813 = vmax.xlane.f32.xlu0 %v812_v30  ;;  %v542_v16 = vcombine.low %v2358_v24, %v2348_v59  ;;  %v631_v30 = vcombine.high %v2192_v7, %v2237_v28  ;;  %v493_v7 = vcombine.high %v489_v61, %v2047_v17 }
  0xf6   : > { %v562_v28 = vcombine.low %v2184_v4, %v2228_v23  ;;  %v670_v18 = vrot.slane %v662_v10, %v2249_v44  ;;  %v715_v4 = vcombine.high %v2220_v14, %v213_v36 }
  0xf7   : > { %v2390_v38 = vrot.slane %v631_v30, %v2240_v31  ;;  %v860_v42 = vsel %vm766_vm0, %v493_v7, -inf }
  0xf8   : > { %v2403_v45 = vrot.slane %v562_v28, %v2240_v31  ;;  %v911_v48 = vsel %vm766_vm0, %v670_v18, -inf  ;;  %v694_v58 = vcombine.high %v670_v18, %v2047_v17 }
  0xf9   : > { %834 = vmax.xlane.f32.xlu1 %v833_v35  ;;  %819 = vmax.xlane.f32.xlu0 %v818_v37  ;;  %v550_v35 = vrot.slane %v542_v16, %v2249_v44  ;;  %v854_v37 = vsel %vm766_vm0, %v492_v29, -inf  ;;  %v678_v41 = vcombine.low %v2390_v38, %v2379_v33  ;;  %v869_v16 = vsel %vm766_vm0, %v541_v9, -inf }
  0xfa   : > { %v594_v50 = vcombine.low %v2403_v45, %v2393_v39  ;;  %v595_v59 = vcombine.high %v2403_v45, %v2393_v39  ;;  %v679_v7 = vcombine.high %v2390_v38, %v2379_v33 }
  0xfb   : > { %v875_v2 = vsel %vm766_vm0, %v550_v35, -inf  ;;  %v560_v51 = vcombine.high %v550_v35, %v2047_v17 }
  0xfc   : > { %v602_v57 = vrot.slane %v594_v50, %v2249_v44  ;;  %v693_v18 = vrot.slane %v679_v7, %v2249_v44 }
  0xfd   : > { %840 = vmax.xlane.f32.xlu1 %v839_v40  ;;  %825 = vmax.xlane.f32.xlu0 %v824_v43  ;;  %v714_v40 = vcombine.low %v2220_v14, %v213_v36  ;;  %v558_v43 = vcombine.high %v534_v3, %v2047_v17  ;;  %v878_v19 = vsel %vm766_vm0, %v560_v51, -inf  ;;  %v2444_v3 = vrot.slane %v715_v4, %v2240_v31 }
  0xfe   : > { %v887_v12 = vsel %vm766_vm0, %v602_v57, -inf  ;;  %v626_v53 = vcombine.high %v602_v57, %v2047_v17 }
  0xff   : > { %v866_v8 = vsel %vm766_vm0, %v558_v43, -inf  ;;  %v746_v35 = vcombine.low %v713_v6, %v2444_v3  ;;  %v929_v43 = vsel %vm766_vm0, %v693_v18, -inf }
 0x100   : > { %v890_v29 = vsel %vm766_vm0, %v626_v53, -inf }
 0x101   : > { %846 = vmax.xlane.f32.xlu1 %v845_v47  ;;  %831 = vmax.xlane.f32.xlu0 %v830_v49  ;;  %v2408_v47 = vrot.slane %v714_v40, %v2240_v31  ;;  %v686_v49 = vrot.slane %v678_v41, %v2249_v44  ;;  %v754_v36 = vrot.slane %v746_v35, %v2249_v44 }
 0x102   : > { %v609_v40 = vrot.slane %v595_v59, %v2249_v44  ;;  %v559_v41 = vcombine.high %v541_v9, %v2047_v17 }
 0x103   : > { %v923_v56 = vsel %vm766_vm0, %v686_v49, -inf  ;;  %v696_v5 = vcombine.high %v686_v49, %v2047_v17  ;;  %v947_v28 = vsel %vm766_vm0, %v754_v36, -inf  ;;  %v764_v33 = vcombine.high %v754_v36, %v2047_v17 }
 0x104   : > { %v893_v39 = vsel %vm766_vm0, %v609_v40, -inf  ;;  %v872_v45 = vsel %vm766_vm0, %v559_v41, -inf }
 0x105   : > { %852 = vmax.xlane.f32.xlu1 %v851_v54  ;;  %837 = vmax.xlane.f32.xlu0 %v836_v0  ;;  %v2417_v54 = vrot.slane %v698_v46, %v2240_v31 }
 0x107   : > { %v730_v0 = vcombine.low %v2417_v54, %v2408_v47  ;;  %v731_v38 = vcombine.high %v2417_v54, %v2408_v47 }
 0x109   : > { %771 = vmax.xlane.f32.xlu1 %v770_v52  ;;  %843 = vmax.xlane.f32.xlu0 %v842_v63  ;;  %v593_v52 = vrot.slane %v579_v55, %v2240_v31  ;;  %v738_v61 = vrot.slane %v730_v0, %v2249_v44  ;;  %v914_v63 = vsel %vm766_vm0, %v694_v58, -inf  ;;  %v745_v49 = vrot.slane %v731_v38, %v2249_v44 }
 0x10a   : > { %v627_v55 = vcombine.high %v609_v40, %v2047_v17  ;;  %v747_v0 = vcombine.high %v713_v6, %v2444_v3 }
 0x10b   : > { %v935_v23 = vsel %vm766_vm0, %v738_v61, -inf  ;;  %v610_v11 = vcombine.low %v577_v1, %v593_v52  ;;  %v762_v30 = vcombine.high %v738_v61, %v2047_v17  ;;  %v941_v51 = vsel %vm766_vm0, %v745_v49, -inf }
 0x10c   : > { %v763_v62 = vcombine.high %v745_v49, %v2047_v17 }
 0x10d   : > { %858 = vmax.xlane.f32.xlu1 %v857_v21  ;;  %849 = vmax.xlane.f32.xlu0 %v848_v25  ;;  %v926_v21 = vsel %vm766_vm0, %v696_v5, -inf  ;;  %v618_v14 = vrot.slane %v610_v11, %v2249_v44  ;;  %v663_v25 = vcombine.high %v2375_v15, %v2364_v20  ;;  %v938_v20 = vsel %vm766_vm0, %v762_v30, -inf }
 0x10e   : > { %v557_v15 = vrot.slane %v543_v32, %v2249_v44 }
 0x10f   : > { %v899_v27 = vsel %vm766_vm0, %v618_v14, -inf }
 0x110   : > { %v881_v24 = vsel %vm766_vm0, %v557_v15, -inf  ;;  %v561_v47 = vcombine.high %v557_v15, %v2047_v17 }
 0x111   : > { %864 = vmax.xlane.f32.xlu1 %v863_v34  ;;  %855 = vmax.xlane.f32.xlu0 %v854_v37  ;;  %v677_v34 = vrot.slane %v663_v25, %v2249_v44  ;;  %v628_v37 = vcombine.high %v618_v14, %v2047_v17 }
 0x113   : > { %v917_v10 = vsel %vm766_vm0, %v677_v34, -inf  ;;  %v695_v57 = vcombine.high %v677_v34, %v2047_v17 }
 0x115   : > { %876 = vmax.xlane.f32.xlu1 %v875_v2  ;;  %861 = vmax.xlane.f32.xlu0 %v860_v42  ;;  %v902_v2 = vsel %vm766_vm0, %v628_v37, -inf  ;;  %v611_v42 = vcombine.high %v577_v1, %v593_v52  ;;  %v920_v60 = vsel %vm766_vm0, %v695_v57, -inf  ;;  %v761_v52 = vrot.slane %v747_v0, %v2249_v44 }
 0x117   : > { %v625_v46 = vrot.slane %v611_v42, %v2249_v44  ;;  %v953_v61 = vsel %vm766_vm0, %v761_v52, -inf  ;;  %v765_v5 = vcombine.high %v761_v52, %v2047_v17 }
 0x119   : > { %912 = vmax.xlane.f32.xlu1 %v911_v48  ;;  %867 = vmax.xlane.f32.xlu0 %v866_v8  ;;  %v950_v48 = vsel %vm766_vm0, %v764_v33, -inf  ;;  %v905_v50 = vsel %vm766_vm0, %v625_v46, -inf  ;;  %v697_v8 = vcombine.high %v693_v18, %v2047_v17  ;;  %v629_v58 = vcombine.high %v625_v46, %v2047_v17 }
 0x11a   : > { %v956_v1 = vsel %vm766_vm0, %v765_v5, -inf }
 0x11b   : > { %v932_v54 = vsel %vm766_vm0, %v697_v8, -inf }
 0x11d   : > { %924 = vmax.xlane.f32.xlu1 %v923_v56  ;;  %879 = vmax.xlane.f32.xlu0 %v878_v19  ;;  %v884_v56 = vsel %vm766_vm0, %v561_v47, -inf  ;;  %v896_v19 = vsel %vm766_vm0, %v627_v55, -inf }
 0x121   : > { %888 = vmax.xlane.f32.xlu1 %v887_v12  ;;  %915 = vmax.xlane.f32.xlu0 %v914_v63  ;;  %v908_v12 = vsel %vm766_vm0, %v629_v58, -inf  ;;  %v944_v63 = vsel %vm766_vm0, %v763_v62, -inf  ;;  %vm1788_vm0 = vcmask 687712  }
 0x125   : > { %936 = vmax.xlane.f32.xlu1 %v935_v23  ;;  %927 = vmax.xlane.f32.xlu0 %v926_v21 }
 0x129   : > { %870 = vmax.xlane.f32.xlu1 %v869_v16  ;;  %891 = vmax.xlane.f32.xlu0 %v890_v29 }
 0x12d   : > { %900 = vmax.xlane.f32.xlu1 %v899_v27  ;;  %939 = vmax.xlane.f32.xlu0 %v938_v20 }
 0x131   : > { %918 = vmax.xlane.f32.xlu1 %v917_v10  ;;  %882 = vmax.xlane.f32.xlu0 %v881_v24 }
 0x135   : > { %948 = vmax.xlane.f32.xlu1 %v947_v28  ;;  %903 = vmax.xlane.f32.xlu0 %v902_v2 }
 0x139   : > { %894 = vmax.xlane.f32.xlu1 %v893_v39  ;;  %930 = vmax.xlane.f32.xlu0 %v929_v43 }
 0x13d   : > { %873 = vmax.xlane.f32.xlu1 %v872_v45  ;;  %951 = vmax.xlane.f32.xlu0 %v950_v48 }
 0x141   : > { %906 = vmax.xlane.f32.xlu1 %v905_v50  ;;  %942 = vmax.xlane.f32.xlu0 %v941_v51 }
 0x145   : > { %933 = vmax.xlane.f32.xlu1 %v932_v54  ;;  %885 = vmax.xlane.f32.xlu0 %v884_v56 }
 0x149   : > { %897 = vmax.xlane.f32.xlu1 %v896_v19  ;;  %921 = vmax.xlane.f32.xlu0 %v920_v60 }
 0x14d   : > { %909 = vmax.xlane.f32.xlu1 %v908_v12  ;;  %954 = vmax.xlane.f32.xlu0 %v953_v61 }
 0x151   : > { %945 = vmax.xlane.f32.xlu0 %v944_v63 }
 0x155   : > { %957 = vmax.xlane.f32.xlu0 %v956_v1 }
 0x162   : > { %v781_v4 = vpop.xlane.xlu1 %780  ;;  %v769_v23 = vpop.xlane.xlu0 %768 }
 0x163   : > { %v967_v16 = vsel %vm959_vm1, %v781_v4, -inf  ;;  %v960_v0 = vsel %vm959_vm1, %v769_v23, -inf }
 0x166   : > { %v787_v9 = vpop.xlane.xlu1 %786  ;;  %v775_v11 = vpop.xlane.xlu0 %774 }
 0x167   : > { %v970_v29 = vsel %vm959_vm1, %v787_v9, -inf  ;;  %v963_v62 = vsel %vm959_vm1, %v775_v11, -inf }
 0x16a   : > { %v2501_v21 = vpop.xlane.xlu1 %792  ;;  %v778_v53 = vpop.xlane.xlu0 %777 }
 0x16b   : > { %v965_v23 = vsel %vm959_vm1, %v778_v53, -inf }
 0x16e   : > { %v2503_v13 = vpop.xlane.xlu1 %798  ;;  %v784_v3 = vpop.xlane.xlu0 %783 }
 0x16f   : > { %v968_v14 = vsel %vm959_vm1, %v784_v3, -inf }
 0x170   : > { %v969_v25 = vmax.f32 %v967_v16, %v968_v14 }
 0x172   : > { %v2508_v30 = vpop.xlane.xlu1 %804  ;;  %v971_v32 = vmax.f32 %v969_v25, %v970_v29  ;;  %v790_v6 = vpop.xlane.xlu0 %789 }
 0x173   : > { %v972_v27 = vsel %vm959_vm1, %v790_v6, -inf }
 0x174   : > { %v2511_v34 = vmax.f32 %v971_v32, %v972_v27 }
 0x176   : > { %v2513_v35 = vpop.xlane.xlu1 %810  ;;  %1108 = vperm.xlu0 %1940, %v2511_v34   ;;  %v2516_v20 = vpop.xlane.xlu0 %795 }
 0x17a   : > { %v817_v15 = vpop.xlane.xlu1 %816  ;;  %v2518_v10 = vpop.xlane.xlu0 %801 }
 0x17b   : > { %v988_v39 = vsel %vm959_vm1, %v817_v15, -inf }
 0x17e   : > { %v823_v36 = vpop.xlane.xlu1 %822  ;;  %v2520_v59 = vpop.xlane.xlu0 %807 }
 0x17f   : > { %v991_v33 = vsel %vm959_vm1, %v823_v36, -inf }
 0x182   : > { %v829_v24 = vpop.xlane.xlu1 %828  ;;  %v2522_v37 = vpop.xlane.xlu0 %813 }
 0x183   : > { %v995_v38 = vsel %vm959_vm1, %v829_v24, -inf }
 0x186   : > { %v835_v7 = vpop.xlane.xlu1 %834  ;;  %v820_v28 = vpop.xlane.xlu0 %819 }
 0x187   : > { %v989_v40 = vsel %vm959_vm1, %v820_v28, -inf  ;;  %v998_v49 = vsel %vm959_vm1, %v835_v7, -inf }
 0x188   : > { %v990_v41 = vmax.f32 %v988_v39, %v989_v40 }
 0x18a   : > { %v841_v2 = vpop.xlane.xlu1 %840  ;;  %v826_v18 = vpop.xlane.xlu0 %825  ;;  %v992_v46 = vmax.f32 %v990_v41, %v991_v33 }
 0x18b   : > { %v993_v50 = vsel %vm959_vm1, %v826_v18, -inf  ;;  %v1002_v52 = vsel %vm959_vm1, %v841_v2, -inf }
 0x18c   : > { %v2532_v55 = vmax.f32 %v992_v46, %v993_v50 }
 0x18e   : > { %v847_v42 = vpop.xlane.xlu1 %846  ;;  %v832_v43 = vpop.xlane.xlu0 %831 }
 0x18f   : > { %v996_v45 = vsel %vm959_vm1, %v832_v43, -inf  ;;  %v1005_v5 = vsel %vm959_vm1, %v847_v42, -inf }
 0x190   : > { %v997_v48 = vmax.f32 %v995_v38, %v996_v45 }
 0x192   : > { %v853_v8 = vpop.xlane.xlu1 %852  ;;  %v999_v51 = vmax.f32 %v997_v48, %v998_v49  ;;  %v838_v47 = vpop.xlane.xlu0 %837 }
 0x193   : > { %v1000_v54 = vsel %vm959_vm1, %v838_v47, -inf  ;;  %v1009_v6 = vsel %vm959_vm1, %v853_v8, -inf }
 0x194   : > { %v2534_v56 = vmax.f32 %v999_v51, %v1000_v54 }
 0x196   : > { %v772_v57 = vpop.xlane.xlu1 %771  ;;  %v1706_v19 = vcombine.low %v2532_v55, %v2534_v56  ;;  %v844_v60 = vpop.xlane.xlu0 %843 }
 0x197   : > { %v961_v58 = vsel %vm959_vm1, %v772_v57, -inf  ;;  %v1003_v61 = vsel %vm959_vm1, %v844_v60, -inf }
 0x198   : > { %v962_v12 = vmax.f32 %v960_v0, %v961_v58  ;;  %v1004_v63 = vmax.f32 %v1002_v52, %v1003_v61 }
 0x19a   : > { %v964_v1 = vmax.f32 %v962_v12, %v963_v62  ;;  %v859_v4 = vpop.xlane.xlu1 %858  ;;  %v1006_v9 = vmax.f32 %v1004_v63, %v1005_v5  ;;  %v850_v3 = vpop.xlane.xlu0 %849 }
 0x19b   : > { %v1007_v16 = vsel %vm959_vm1, %v850_v3, -inf  ;;  %v1012_v15 = vsel %vm959_vm1, %v859_v4, -inf }
 0x19c   : > { %v2546_v14 = vmax.f32 %v964_v1, %v965_v23  ;;  %v2548_v25 = vmax.f32 %v1006_v9, %v1007_v16  ;;  %v975_v9 = vsel %vm959_vm1, %v2516_v20, -inf }
 0x19e   : > { %v865_v29 = vpop.xlane.xlu1 %864  ;;  %1105 = vperm.xlu1 %1939, %v2546_v14   ;;  %v1704_v11 = vcombine.low %v2546_v14, %v2511_v34  ;;  %v856_v32 = vpop.xlane.xlu0 %855 }
 0x19f   : > { %v1010_v27 = vsel %vm959_vm1, %v856_v32, -inf  ;;  %v1016_v0 = vsel %vm959_vm1, %v865_v29, -inf }
 0x1a0   : > { %v1011_v53 = vmax.f32 %v1009_v6, %v1010_v27  ;;  %v974_v6 = vsel %vm959_vm1, %v2501_v21, -inf }
 0x1a2   : > { %v877_v36 = vpop.xlane.xlu1 %876  ;;  %1129 = vperm.xlu1 %1939, %v2532_v55   ;;  %v1013_v24 = vmax.f32 %v1011_v53, %v1012_v15  ;;  %v862_v7 = vpop.xlane.xlu0 %861  ;;  %v976_v15 = vmax.f32 %v974_v6, %v975_v9 }
 0x1a3   : > { %v1014_v28 = vsel %vm959_vm1, %v862_v7, -inf  ;;  %v1023_v3 = vsel %vm959_vm1, %v877_v36, -inf }
 0x1a4   : > { %v2558_v40 = vmax.f32 %v1013_v24, %v1014_v28 }
 0x1a6   : > { %v913_v2 = vpop.xlane.xlu1 %912  ;;  %1132 = vperm.xlu1 %1939, %v2534_v56   ;;  %v868_v18 = vpop.xlane.xlu0 %867 }
 0x1a7   : > { %v1017_v54 = vsel %vm959_vm1, %v868_v18, -inf  ;;  %v1044_v24 = vsel %vm959_vm1, %v913_v2, -inf }
 0x1a8   : > { %v1018_v52 = vmax.f32 %v1016_v0, %v1017_v54 }
 0x1aa   : > { %v925_v39 = vpop.xlane.xlu1 %924  ;;  %v880_v41 = vpop.xlane.xlu0 %879 }
 0x1ab   : > { %v1024_v1 = vsel %vm959_vm1, %v880_v41, -inf  ;;  %v1051_v36 = vsel %vm959_vm1, %v925_v39, -inf }
 0x1ac   : > { %v1025_v29 = vmax.f32 %v1023_v3, %v1024_v1 }
 0x1ae   : > { %v889_v42 = vpop.xlane.xlu1 %888  ;;  %v916_v43 = vpop.xlane.xlu0 %915 }
 0x1af   : > { %v1045_v32 = vsel %vm959_vm1, %v916_v43, -inf  ;;  %v1030_v2 = vsel %vm959_vm1, %v889_v42, -inf  ;;  %v977_v42 = vsel %vm959_vm1, %v2503_v13, -inf }
 0x1b0   : > { %v1046_v18 = vmax.f32 %v1044_v24, %v1045_v32 }
 0x1b2   : > { %v2561_v33 = vpop.xlane.xlu1 %936  ;;  %v928_v38 = vpop.xlane.xlu0 %927 }
 0x1b3   : > { %v1052_v27 = vsel %vm959_vm1, %v928_v38, -inf }
 0x1b6   : > { %v871_v45 = vpop.xlane.xlu1 %870  ;;  %v892_v46 = vpop.xlane.xlu0 %891 }
 0x1b7   : > { %v1019_v58 = vsel %vm959_vm1, %v871_v45, -inf  ;;  %v1053_v45 = vmax.f32 %v1051_v36, %v1052_v27  ;;  %v1031_v21 = vsel %vm959_vm1, %v892_v46, -inf  ;;  %v1058_v36 = vsel %vm959_vm1, %v2561_v33, -inf }
 0x1b8   : > { %v1020_v12 = vmax.f32 %v1018_v52, %v1019_v58 }
 0x1ba   : > { %v901_v48 = vpop.xlane.xlu1 %900  ;;  %v2563_v49 = vpop.xlane.xlu0 %939 }
 0x1bb   : > { %v1059_v24 = vsel %vm959_vm1, %v2563_v49, -inf  ;;  %v1089_v49 = vrot.slane %v2511_v34, 2 }
 0x1be   : > { %v919_v50 = vpop.xlane.xlu1 %918  ;;  %v883_v8 = vpop.xlane.xlu0 %882 }
 0x1bf   : > { %v1026_v16 = vsel %vm959_vm1, %v883_v8, -inf  ;;  %v1047_v7 = vsel %vm959_vm1, %v919_v50, -inf  ;;  %v1037_v50 = vsel %vm959_vm1, %v901_v48, -inf }
 0x1c0   : > { %v1027_v28 = vmax.f32 %v1025_v29, %v1026_v16  ;;  %v1048_v54 = vmax.f32 %v1046_v18, %v1047_v7 }
 0x1c2   : > { %v2565_v51 = vpop.xlane.xlu1 %948  ;;  %v904_v47 = vpop.xlane.xlu0 %903 }
 0x1c3   : > { %v1038_v38 = vsel %vm959_vm1, %v904_v47, -inf  ;;  %v1065_v18 = vsel %vm959_vm1, %v2565_v51, -inf  ;;  %v981_v51 = vsel %vm959_vm1, %v2508_v30, -inf  ;;  %v1093_v30 = vrot.slane %v2534_v56, 2 }
 0x1c4   : > { %v1039_v48 = vmax.f32 %v1037_v50, %v1038_v38 }
 0x1c6   : > { %v895_v57 = vpop.xlane.xlu1 %894  ;;  %v931_v60 = vpop.xlane.xlu0 %930 }
 0x1c7   : > { %v1054_v41 = vsel %vm959_vm1, %v931_v60, -inf  ;;  %v1033_v58 = vsel %vm959_vm1, %v895_v57, -inf }
 0x1c8   : > { %v1055_v60 = vmax.f32 %v1053_v45, %v1054_v41 }
 0x1ca   : > { %v874_v61 = vpop.xlane.xlu1 %873  ;;  %v952_v63 = vpop.xlane.xlu0 %951 }
 0x1cb   : > { %v1021_v62 = vsel %vm959_vm1, %v874_v61, -inf  ;;  %v1066_v7 = vsel %vm959_vm1, %v952_v63, -inf  ;;  %v1060_v63 = vmax.f32 %v1058_v36, %v1059_v24 }
 0x1cc   : > { %v2571_v5 = vmax.f32 %v1020_v12, %v1021_v62  ;;  %v1032_v12 = vmax.f32 %v1030_v2, %v1031_v21  ;;  %v978_v62 = vmax.f32 %v976_v15, %v977_v42  ;;  %v1067_v45 = vmax.f32 %v1065_v18, %v1066_v7 }
 0x1cd   : > { %v982_v21 = vsel %vm959_vm1, %v2520_v59, -inf }
 0x1ce   : > { %v907_v4 = vpop.xlane.xlu1 %906  ;;  %1153 = vperm.xlu1 %1939, %v2571_v5   ;;  %v943_v23 = vpop.xlane.xlu0 %942  ;;  %v1034_v3 = vmax.f32 %v1032_v12, %v1033_v58 }
 0x1cf   : > { %v1040_v52 = vsel %vm959_vm1, %v907_v4, -inf  ;;  %v979_v4 = vsel %vm959_vm1, %v2518_v10, -inf  ;;  %v1088_v10 = vrot.slane %v2546_v14, 2  ;;  %v1061_v41 = vsel %vm959_vm1, %v943_v23, -inf }
 0x1d0   : > { %v1041_v16 = vmax.f32 %v1039_v48, %v1040_v52  ;;  %v2619_v15 = vmax.f32 %v978_v62, %v979_v4  ;;  %v1062_v2 = vmax.f32 %v1060_v63, %v1061_v41 }
 0x1d2   : > { %v934_v53 = vpop.xlane.xlu1 %933  ;;  %v886_v20 = vpop.xlane.xlu0 %885 }
 0x1d3   : > { %v1028_v43 = vsel %vm959_vm1, %v886_v20, -inf  ;;  %v1056_v0 = vsel %vm959_vm1, %v934_v53, -inf }
 0x1d4   : > { %v2590_v8 = vmax.f32 %v1027_v28, %v1028_v43  ;;  %v2603_v1 = vmax.f32 %v1055_v60, %v1056_v0  ;;  %v1092_v0 = vrot.slane %v2532_v55, 2  ;;  %v984_v60 = vsel %vm959_vm1, %v2513_v35, -inf }
 0x1d5   : > { %v1090_v35 = vrot.slane %v2619_v15, 2 }
 0x1d6   : > { %v898_v39 = vpop.xlane.xlu1 %897  ;;  %v1708_v46 = vcombine.low %v2571_v5, %v2590_v8  ;;  %1156 = vperm.xlu1 %1939, %v2590_v8   ;;  %v922_v47 = vpop.xlane.xlu0 %921  ;;  %v1097_v12 = vrot.slane %v2590_v8, 2  ;;  %v1101_v48 = vrot.slane %v2603_v1, 2 }
 0x1d7   : > { %v1049_v61 = vsel %vm959_vm1, %v922_v47, -inf  ;;  %v1035_v57 = vsel %vm959_vm1, %v898_v39, -inf  ;;  %v986_v47 = vsel %vm959_vm1, %v2522_v37, -inf  ;;  %v1094_v37 = vrot.slane %v2548_v25, 2 }
 0x1d8   : > { %v2606_v9 = vmax.f32 %v1048_v54, %v1049_v61  ;;  %v2615_v27 = vmax.f32 %v1034_v3, %v1035_v57  ;;  %v983_v54 = vmax.f32 %v981_v51, %v982_v21  ;;  %v1096_v61 = vrot.slane %v2571_v5, 2 }
 0x1da   : > { %v910_v29 = vpop.xlane.xlu1 %909  ;;  %v1710_v13 = vcombine.low %v2606_v9, %v2603_v1  ;;  %1180 = vperm.xlu1 %1939, %v2603_v1   ;;  %1177 = vperm.xlu0 %1940, %v2606_v9   ;;  %v955_v6 = vpop.xlane.xlu0 %954  ;;  %v985_v52 = vmax.f32 %v983_v54, %v984_v60  ;;  %v1100_v62 = vrot.slane %v2606_v9, 2  ;;  %v1098_v57 = vrot.slane %v2615_v27, 2 }
 0x1db   : > { %v1042_v32 = vsel %vm959_vm1, %v910_v29, -inf  ;;  %v1068_v43 = vsel %vm959_vm1, %v955_v6, -inf }
 0x1dc   : > { %v2617_v53 = vmax.f32 %v1041_v16, %v1042_v32  ;;  %v1069_v50 = vmax.f32 %v1067_v45, %v1068_v43  ;;  %v2656_v42 = vmax.f32 %v985_v52, %v986_v47  ;;  %v1095_v16 = vrot.slane %v2558_v40, 2 }
 0x1dd   : > { %v2687_v52 = vand.u32 127, %v227_v22 }
 0x1de   : > { %v1709_v28 = vcombine.low %v2615_v27, %v2617_v53  ;;  %1117 = vperm.xlu1 %1939, %v1088_v10   ;;  %1111 = vperm.xlu0 %1940, %v2619_v15   ;;  %v946_v20 = vpop.xlane.xlu0 %945  ;;  %v1091_v3 = vrot.slane %v2656_v42, 2  ;;  %v1099_v29 = vrot.slane %v2617_v53, 2 }
 0x1df   : > { %v1063_v38 = vsel %vm959_vm1, %v946_v20, -inf }
 0x1e0   : > { %v2643_v39 = vmax.f32 %v1062_v2, %v1063_v38 }
 0x1e2   : > { %1120 = vperm.xlu1 %1939, %v1089_v49   ;;  %1135 = vperm.xlu0 %1940, %v2548_v25   ;;  %v958_v33 = vpop.xlane.xlu0 %957  ;;  %v1102_v4 = vrot.slane %v2643_v39, 2 }
 0x1e3   : > { %v1070_v23 = vsel %vm959_vm1, %v958_v33, -inf  ;;  %vm1791_vm1 = vcmask 680096  }
 0x1e4   : > { %v2645_v58 = vmax.f32 %v1069_v50, %v1070_v23 }
 0x1e6   : > { %v1711_v59 = vcombine.low %v2643_v39, %v2645_v58  ;;  %1141 = vperm.xlu1 %1939, %v1092_v0   ;;  %1159 = vperm.xlu0 %1940, %v2615_v27   ;;  %v1103_v32 = vrot.slane %v2645_v58, 2 }
 0x1ea   : > { %1144 = vperm.xlu1 %1939, %v1093_v30   ;;  %1183 = vperm.xlu0 %1940, %v2643_v39   ;;  %v1741_v39 = vadd.s32 4294967268, %v2687_v52 }
 0x1ee   : > { %1168 = vperm.xlu1 %1939, %v1097_v12   ;;  %1114 = vperm.xlu0 %1940, %v2656_v42   ;;  %v2693_v12 = vsub.s32 %v2687_v52, %v2233_v26 }
 0x1f2   : > { %1192 = vperm.xlu1 %1939, %v1101_v48   ;;  %1138 = vperm.xlu0 %1940, %v2558_v40  }
 0x1f5   : > { %v1109_v20 = vpop.permute.xlu0 %1108 }
 0x1f6   : > { %1123 = vperm.xlu1 %1939, %v1090_v35   ;;  %1165 = vperm.xlu0 %1940, %v1096_v61  }
 0x1fa   : > { %1147 = vperm.xlu1 %1939, %v1094_v37   ;;  %1189 = vperm.xlu0 %1940, %v1100_v62   ;;  %v1209_v62 = vrot.slane %v1109_v20, %v2693_v12 }
 0x1fe   : > { %1171 = vperm.xlu1 %1939, %v1098_v57   ;;  %1162 = vperm.xlu0 %1940, %v2617_v53  }
 0x202   : > { %1195 = vperm.xlu1 %1939, %v1102_v4   ;;  %1186 = vperm.xlu0 %1940, %v2645_v58   ;;  %v1736_v58 = vadd.s32 4294967276, %v2687_v52 }
 0x206   : > { %1126 = vperm.xlu1 %1939, %v1091_v3  }
 0x20a   : > { %1150 = vperm.xlu1 %1939, %v1095_v16  }
 0x20e   : > { %1174 = vperm.xlu1 %1939, %v1099_v29  }
 0x212   : > { %1198 = vperm.xlu1 %1939, %v1103_v32  }
 0x21d   : > { %v1106_v6 = vpop.permute.xlu1 %1105 }
 0x21e   : > { %v1205_v48 = vrot.slane %v1106_v6, %v2693_v12 }
 0x220   : > { %v1331_v29 = vsel %vm1330_vm2, %v1209_v62, %v1205_v48 }
 0x221   : > { %v1130_v10 = vpop.permute.xlu1 %1129 }
 0x222   : > { %v1237_v20 = vrot.slane %v1130_v10, %v2693_v12 }
 0x225   : > { %v1133_v24 = vpop.permute.xlu1 %1132 }
 0x226   : > { %v1241_v4 = vrot.slane %v1133_v24, %v2693_v12 }
 0x24d   : > { %v1154_v7 = vpop.permute.xlu1 %1153 }
 0x255   : > { %v1157_v36 = vpop.permute.xlu1 %1156 }
 0x256   : > { %v1273_v3 = vrot.slane %v1157_v36, %v2693_v12 }
 0x259   : > { %v2674_v18 = vpop.permute.xlu1 %1180  ;;  %v2676_v41 = vpop.permute.xlu0 %1177 }
 0x25d   : > { %v1118_v43 = vpop.permute.xlu1 %1117  ;;  %v1112_v49 = vpop.permute.xlu0 %1111 }
 0x25e   : > { %v1213_v35 = vrot.slane %v1112_v49, %v2693_v12  ;;  %v1221_v32 = vrot.slane %v1118_v43, %v2693_v12  ;;  %v1269_v49 = vrot.slane %v1154_v7, %v2693_v12 }
 0x260   : > { %v1345_v62 = vsel %vm1330_vm2, %v1273_v3, %v1269_v49 }
 0x261   : > { %v1121_v63 = vpop.permute.xlu1 %1120  ;;  %v1136_v45 = vpop.permute.xlu0 %1135 }
 0x262   : > { %v1225_v22 = vrot.slane %v1121_v63, %v2693_v12  ;;  %v1245_v6 = vrot.slane %v1136_v45, %v2693_v12  ;;  %v1333_v63 = vsel %vm1332_vm3, %v1213_v35, %v1331_v29  ;;  %v1339_v45 = vsel %vm1330_vm2, %v1241_v4, %v1237_v20 }
 0x264   : > { %v1336_v36 = vsel %vm1330_vm2, %v1225_v22, %v1221_v32 }
 0x265   : > { %v1142_v21 = vpop.permute.xlu1 %1141  ;;  %v2678_v38 = vpop.permute.xlu0 %1159 }
 0x266   : > { %v1253_v29 = vrot.slane %v1142_v21, %v2693_v12 }
 0x269   : > { %v1145_v2 = vpop.permute.xlu1 %1144  ;;  %v2680_v50 = vpop.permute.xlu0 %1183 }
 0x26d   : > { %v2682_v33 = vpop.permute.xlu1 %1168  ;;  %v1115_v51 = vpop.permute.xlu0 %1114 }
 0x26e   : > { %v1217_v57 = vrot.slane %v1115_v51, %v2693_v12 }
 0x270   : > { %v1335_v48 = vsel %vm1334_vm4, %v1217_v57, %v1333_v63 }
 0x271   : > { %v2684_v23 = vpop.permute.xlu1 %1192  ;;  %v1139_v54 = vpop.permute.xlu0 %1138  ;;  %v1364_v57 = vrot.slane %v1335_v48, %v2240_v31 }
 0x272   : > { %v1249_v24 = vrot.slane %v1139_v54, %v2693_v12  ;;  %v1340_v54 = vsel %vm1332_vm3, %v1245_v6, %v1339_v45  ;;  %v1289_v6 = vrot.slane %v2682_v33, %v2693_v12 }
 0x274   : > { %v1341_v4 = vsel %vm1334_vm4, %v1249_v24, %v1340_v54 }
 0x275   : > { %v1124_v0 = vpop.permute.xlu1 %1123  ;;  %v1166_v30 = vpop.permute.xlu0 %1165 }
 0x276   : > { %v1229_v16 = vrot.slane %v1124_v0, %v2693_v12  ;;  %v1257_v0 = vrot.slane %v1145_v2, %v2693_v12  ;;  %v1277_v2 = vrot.slane %v2678_v38, %v2693_v12  ;;  %v1285_v3 = vrot.slane %v1166_v30, %v2693_v12 }
 0x277   : > { %v1305_v30 = vrot.slane %v2674_v18, %v2693_v12 }
 0x278   : > { %v1337_v10 = vsel %vm1332_vm3, %v1229_v16, %v1336_v36  ;;  %v1398_v36 = vrot.slane %v1341_v4, %v2240_v31 }
 0x279   : > { %v1148_v60 = vpop.permute.xlu1 %1147  ;;  %v2697_v61 = vpop.permute.xlu0 %1189 }
 0x27a   : > { %v1261_v7 = vrot.slane %v1148_v60, %v2693_v12  ;;  %v1342_v60 = vsel %vm1330_vm2, %v1257_v0, %v1253_v29  ;;  %v1348_v0 = vsel %vm1330_vm2, %v1289_v6, %v1285_v3  ;;  %v1317_v48 = vrot.slane %v2697_v61, %v2693_v12 }
 0x27c   : > { %v1343_v20 = vsel %vm1332_vm3, %v1261_v7, %v1342_v60 }
 0x27d   : > { %v2689_v47 = vpop.permute.xlu1 %1171  ;;  %v1163_v35 = vpop.permute.xlu0 %1162 }
 0x27e   : > { %v1281_v21 = vrot.slane %v1163_v35, %v2693_v12  ;;  %v1293_v49 = vrot.slane %v2689_v47, %v2693_v12  ;;  %v1321_v35 = vrot.slane %v2684_v23, %v2693_v12 }
 0x280   : > { %v1349_v54 = vsel %vm1332_vm3, %v1293_v49, %v1348_v0  ;;  %v1354_v3 = vsel %vm1330_vm2, %v1321_v35, %v1317_v48 }
 0x281   : > { %v2699_v37 = vpop.permute.xlu1 %1195  ;;  %v1187_v61 = vpop.permute.xlu0 %1186 }
 0x282   : > { %v1325_v18 = vrot.slane %v2699_v37, %v2693_v12 }
 0x284   : > { %v1355_v6 = vsel %vm1332_vm3, %v1325_v18, %v1354_v3 }
 0x285   : > { %v1127_v51 = vpop.permute.xlu1 %1126 }
 0x286   : > { %v1233_v43 = vrot.slane %v1127_v51, %v2693_v12  ;;  %v1346_v51 = vsel %vm1332_vm3, %v1277_v2, %v1345_v62 }
 0x288   : > { %v1338_v22 = vsel %vm1334_vm4, %v1233_v43, %v1337_v10  ;;  %v1347_v10 = vsel %vm1334_vm4, %v1281_v21, %v1346_v51 }
 0x289   : > { %v1372_v16 = vrot.slane %v1338_v22, %v2240_v31  ;;  %v1151_v32 = vpop.permute.xlu1 %1150  ;;  %v1301_v22 = vrot.slane %v2676_v41, %v2693_v12  ;;  %v1432_v23 = vrot.slane %v1347_v10, %v2240_v31  ;;  %v1313_v41 = vrot.slane %v1187_v61, %v2693_v12 }
 0x28a   : > { %v1265_v38 = vrot.slane %v1151_v32, %v2693_v12 }
 0x28b   : > { %v1373_v63 = vcombine.low %v1364_v57, %v1372_v16  ;;  %v1374_v24 = vcombine.high %v1364_v57, %v1372_v16  ;;  %v1309_v57 = vrot.slane %v2680_v50, %v2693_v12 }
 0x28c   : > { %v1344_v33 = vsel %vm1334_vm4, %v1265_v38, %v1343_v20 }
 0x28d   : > { %v1406_v43 = vrot.slane %v1344_v33, %v2240_v31  ;;  %v1175_v45 = vpop.permute.xlu1 %1174  ;;  %v1381_v47 = vrot.slane %v1373_v63, %v2249_v44  ;;  %v1388_v7 = vrot.slane %v1374_v24, %v2249_v44  ;;  %v1351_v24 = vsel %vm1330_vm2, %v1305_v30, %v1301_v22 }
 0x28e   : > { %v1297_v62 = vrot.slane %v1175_v45, %v2693_v12 }
 0x28f   : > { %v1494_v29 = vsel %vm1493_vm5, %v1381_v47, -inf  ;;  %v1407_v2 = vcombine.low %v1398_v36, %v1406_v43  ;;  %v1408_v4 = vcombine.high %v1398_v36, %v1406_v43  ;;  %v1390_v50 = vcombine.high %v1388_v7, %v2047_v17 }
 0x290   : > { %v1350_v37 = vsel %vm1334_vm4, %v1297_v62, %v1349_v54  ;;  %1495 = vmax.xlane.f32.xlu0 %v1494_v29  ;;  %v1500_v38 = vsel %vm1493_vm5, %v1388_v7, -inf  ;;  %v1352_v36 = vsel %vm1332_vm3, %v1309_v57, %v1351_v24 }
 0x291   : > { %v1440_v16 = vrot.slane %v1350_v37, %v2240_v31  ;;  %v1199_v32 = vpop.permute.xlu1 %1198  ;;  %v1415_v60 = vrot.slane %v1407_v2, %v2249_v44  ;;  %v1422_v49 = vrot.slane %v1408_v4, %v2249_v44  ;;  %v1353_v33 = vsel %vm1334_vm4, %v1313_v41, %v1352_v36 }
 0x292   : > { %v1329_v21 = vrot.slane %v1199_v32, %v2693_v12  ;;  %v1503_v0 = vsel %vm1493_vm5, %v1390_v50, -inf  ;;  %v1466_v30 = vrot.slane %v1353_v33, %v2240_v31  ;;  %v1389_v37 = vcombine.high %v1381_v47, %v2047_v17 }
 0x293   : > { %v1506_v20 = vsel %vm1493_vm5, %v1415_v60, -inf  ;;  %v1441_v63 = vcombine.low %v1432_v23, %v1440_v16  ;;  %v1423_v48 = vcombine.high %v1415_v60, %v2047_v17  ;;  %v1512_v45 = vsel %vm1493_vm5, %v1422_v49, -inf }
 0x294   : > { %v1356_v51 = vsel %vm1334_vm4, %v1329_v21, %v1355_v6  ;;  %1501 = vmax.xlane.f32.xlu0 %v1500_v38  ;;  %1507 = vmax.xlane.f32.xlu1 %v1506_v20  ;;  %v1442_v18 = vcombine.high %v1432_v23, %v1440_v16  ;;  %v1424_v62 = vcombine.high %v1422_v49, %v2047_v17  ;;  %v1497_v60 = vsel %vm1493_vm5, %v1389_v37, -inf }
 0x295   : > { %v1474_v43 = vrot.slane %v1356_v51, %v2240_v31  ;;  %v1449_v10 = vrot.slane %v1441_v63, %v2249_v44  ;;  %v1509_v7 = vsel %vm1493_vm5, %v1423_v48, -inf  ;;  %v1705_v20 = vcombine.low %v2619_v15, %v2656_v42 }
 0x296   : > { %v1456_v54 = vrot.slane %v1442_v18, %v2249_v44  ;;  %v1515_v29 = vsel %vm1493_vm5, %v1424_v62, -inf }
 0x297   : > { %v1518_v35 = vsel %vm1493_vm5, %v1449_v10, -inf  ;;  %v1475_v61 = vcombine.low %v1466_v30, %v1474_v43  ;;  %v1457_v22 = vcombine.high %v1449_v10, %v2047_v17  ;;  %v1476_v16 = vcombine.high %v1466_v30, %v1474_v43 }
 0x298   : > { %1504 = vmax.xlane.f32.xlu0 %v1503_v0  ;;  %1513 = vmax.xlane.f32.xlu1 %v1512_v45  ;;  %v1524_v2 = vsel %vm1493_vm5, %v1456_v54, -inf  ;;  %v1458_v23 = vcombine.high %v1456_v54, %v2047_v17 }
 0x299   : > { %v1483_v57 = vrot.slane %v1475_v61, %v2249_v44  ;;  %v1521_v4 = vsel %vm1493_vm5, %v1457_v22, -inf  ;;  %v1490_v6 = vrot.slane %v1476_v16, %v2249_v44  ;;  %v1707_v44 = vcombine.low %v2548_v25, %v2558_v40 }
 0x29a   : > { %v1527_v32 = vsel %vm1493_vm5, %v1458_v23, -inf }
 0x29b   : > { %v1530_v3 = vsel %vm1493_vm5, %v1483_v57, -inf  ;;  %v1491_v41 = vcombine.high %v1483_v57, %v2047_v17  ;;  %v1536_v47 = vsel %vm1493_vm5, %v1490_v6, -inf  ;;  %v1492_v50 = vcombine.high %v1490_v6, %v2047_v17 }
 0x29c   : > { %1510 = vmax.xlane.f32.xlu0 %v1509_v7  ;;  %1519 = vmax.xlane.f32.xlu1 %v1518_v35 }
 0x29d   : > { %v1533_v21 = vsel %vm1493_vm5, %v1491_v41, -inf  ;;  %v1539_v38 = vsel %vm1493_vm5, %v1492_v50, -inf }
 0x2a0   : > { %1516 = vmax.xlane.f32.xlu0 %v1515_v29  ;;  %1525 = vmax.xlane.f32.xlu1 %v1524_v2 }
 0x2a4   : > { %1522 = vmax.xlane.f32.xlu0 %v1521_v4  ;;  %1531 = vmax.xlane.f32.xlu1 %v1530_v3 }
 0x2a8   : > { %1528 = vmax.xlane.f32.xlu0 %v1527_v32  ;;  %1498 = vmax.xlane.f32.xlu1 %v1497_v60 }
 0x2ac   : > { %1537 = vmax.xlane.f32.xlu1 %v1536_v47  ;;  %1534 = vmax.xlane.f32.xlu0 %v1533_v21 }
 0x2b0   : > { %1540 = vmax.xlane.f32.xlu0 %v1539_v38 }
 0x2bd   : > { %1713 = vperm.xlu1 %1939, %v1704_v11  }
 0x2c1   : > { %1719 = vperm.xlu1 %1939, %v1706_v19  }
 0x2c5   : > { %1722 = vperm.xlu1 %1939, %v1707_v44  }
 0x2c6   : > { %1716 = vperm.xlu0 %1940, %v1705_v20  }
 0x2c9   : > { %1728 = vperm.xlu1 %1939, %v1709_v28  }
 0x2ca   : > { %1725 = vperm.xlu0 %1940, %v1708_v46  }
 0x31d   : > { %v1496_v17 = vpop.xlane.xlu0 %1495 }
 0x31e   : > { %v1543_v62 = vsel %vm1542_vm6, %v1496_v17, -inf }
 0x321   : > { %v1508_v34 = vpop.xlane.xlu1 %1507  ;;  %v1502_v55 = vpop.xlane.xlu0 %1501 }
 0x322   : > { %v1546_v14 = vsel %vm1542_vm6, %v1502_v55, -inf  ;;  %v1549_v5 = vsel %vm1542_vm6, %v1508_v34, -inf }
 0x325   : > { %v1514_v56 = vpop.xlane.xlu1 %1513  ;;  %v1505_v19 = vpop.xlane.xlu0 %1504 }
 0x326   : > { %v1547_v25 = vsel %vm1542_vm6, %v1505_v19, -inf  ;;  %v1552_v49 = vsel %vm1542_vm6, %v1514_v56, -inf }
 0x327   : > { %v1548_v11 = vmax.f32 %v1546_v14, %v1547_v25 }
 0x329   : > { %v1520_v40 = vpop.xlane.xlu1 %1519  ;;  %v1511_v15 = vpop.xlane.xlu0 %1510  ;;  %v1574_v27 = vsel %vm1542_vm6, %v1548_v11, -inf }
 0x32a   : > { %v1550_v53 = vsel %vm1542_vm6, %v1511_v15, -inf  ;;  %v1575_v8 = vrot.slane %v1574_v27, 4  ;;  %v1555_v45 = vsel %vm1542_vm6, %v1520_v40, -inf }
 0x32b   : > { %v1551_v46 = vmax.f32 %v1549_v5, %v1550_v53 }
 0x32c   : > { %v1576_v51 = vmax.f32 %v1574_v27, %v1575_v8 }
 0x32d   : > { %v1526_v28 = vpop.xlane.xlu1 %1525  ;;  %v1517_v42 = vpop.xlane.xlu0 %1516  ;;  %v1581_v36 = vsel %vm1542_vm6, %v1551_v46, -inf }
 0x32e   : > { %v1553_v63 = vsel %vm1542_vm6, %v1517_v42, -inf  ;;  %v1582_v18 = vrot.slane %v1581_v36, 4  ;;  %v1577_v7 = vrot.slane %v1576_v51, 2  ;;  %v1558_v61 = vsel %vm1542_vm6, %v1526_v28, -inf }
 0x32f   : > { %v1554_v24 = vmax.f32 %v1552_v49, %v1553_v63 }
 0x330   : > { %v1583_v23 = vmax.f32 %v1581_v36, %v1582_v18  ;;  %v1578_v38 = vmax.f32 %v1576_v51, %v1577_v7 }
 0x331   : > { %v1588_v33 = vsel %vm1542_vm6, %v1554_v24, -inf  ;;  %v1532_v0 = vpop.xlane.xlu1 %1531  ;;  %v1523_v48 = vpop.xlane.xlu0 %1522  ;;  %v1650_v57 = vcombine.low %v1551_v46, %v1554_v24 }
 0x332   : > { %v1589_v43 = vrot.slane %v1588_v33, 4  ;;  %v1556_v10 = vsel %vm1542_vm6, %v1523_v48, -inf  ;;  %v1584_v55 = vrot.slane %v1583_v23, 2  ;;  %v1561_v56 = vsel %vm1542_vm6, %v1532_v0, -inf }
 0x333   : > { %v1557_v30 = vmax.f32 %v1555_v45, %v1556_v10  ;;  %v1664_v44 = vrot.slane %v1650_v57, %v2240_v31  ;;  %v1579_v24 = vrot.slane %v1578_v38, 1 }
 0x334   : > { %v1590_v29 = vmax.f32 %v1588_v33, %v1589_v43  ;;  %v1585_v51 = vmax.f32 %v1583_v23, %v1584_v55 }
 0x335   : > { %v1499_v35 = vpop.xlane.xlu1 %1498  ;;  %v1529_v54 = vpop.xlane.xlu0 %1528  ;;  %v1595_v2 = vsel %vm1542_vm6, %v1557_v30, -inf }
 0x336   : > { %v1544_v22 = vsel %vm1542_vm6, %v1499_v35, -inf  ;;  %v1596_v37 = vrot.slane %v1595_v2, 4  ;;  %v1559_v3 = vsel %vm1542_vm6, %v1529_v54, -inf  ;;  %v1591_v47 = vrot.slane %v1590_v29, 2 }
 0x337   : > { %v1545_v4 = vmax.f32 %v1543_v62, %v1544_v22  ;;  %v1560_v16 = vmax.f32 %v1558_v61, %v1559_v3  ;;  %v1586_v61 = vrot.slane %v1585_v51, 1 }
 0x338   : > { %v1597_v32 = vmax.f32 %v1595_v2, %v1596_v37  ;;  %v1592_v53 = vmax.f32 %v1590_v29, %v1591_v47 }
 0x339   : > { %v1567_v60 = vsel %vm1542_vm6, %v1545_v4, -inf  ;;  %v1649_v6 = vcombine.low %v1545_v4, %v1548_v11  ;;  %v1535_v41 = vpop.xlane.xlu0 %1534  ;;  %v1602_v50 = vsel %vm1542_vm6, %v1560_v16, -inf  ;;  %v1538_v34 = vpop.xlane.xlu1 %1537  ;;  %v1666_v42 = vcombine.low %v1557_v30, %v1560_v16 }
 0x33a   : > { %v1568_v21 = vrot.slane %v1567_v60, 4  ;;  %v1603_v17 = vrot.slane %v1602_v50, 4  ;;  %v1562_v14 = vsel %vm1542_vm6, %v1535_v41, -inf  ;;  %v1598_v25 = vrot.slane %v1597_v32, 2 }
 0x33b   : > { %v1657_v20 = vrot.slane %v1649_v6, %v2240_v31  ;;  %v1563_v40 = vmax.f32 %v1561_v56, %v1562_v14  ;;  %v1564_v8 = vsel %vm1542_vm6, %v1538_v34, -inf  ;;  %v1593_v10 = vrot.slane %v1592_v53, 1 }
 0x33c   : > { %v1569_v19 = vmax.f32 %v1567_v60, %v1568_v21  ;;  %v1604_v11 = vmax.f32 %v1602_v50, %v1603_v17  ;;  %v1599_v0 = vmax.f32 %v1597_v32, %v1598_v25  ;;  %v1674_v30 = vrot.slane %v1666_v42, %v2240_v31 }
 0x33d   : > { %v1541_v15 = vpop.xlane.xlu0 %1540  ;;  %v1665_v27 = vcombine.low %v1657_v20, %v1664_v44  ;;  %v1609_v49 = vsel %vm1542_vm6, %v1563_v40, -inf  ;;  %v1580_v4 = vmax.f32 %v1578_v38, %v1579_v24  ;;  %v1594_v3 = vmax.f32 %v1592_v53, %v1593_v10  ;;  %v1714_v55 = vpop.permute.xlu1 %1713 }
 0x33e   : > { %v1570_v5 = vrot.slane %v1569_v19, 2  ;;  %v1565_v46 = vsel %vm1542_vm6, %v1541_v15, -inf  ;;  %v1605_v28 = vrot.slane %v1604_v11, 2  ;;  %v1610_v33 = vrot.slane %v1609_v49, 4 }
 0x33f   : > { %v1566_v63 = vmax.f32 %v1564_v8, %v1565_v46  ;;  %1684 = vperm.xlu0 %1940, %v1665_v27   ;;  %v1600_v57 = vrot.slane %v1599_v0, 1  ;;  %v1587_v60 = vmax.f32 %v1585_v51, %v1586_v61  ;;  %v1748_v14 = vadd.s32 4294967260, %v2687_v52 }
 0x340   : > { %v1571_v36 = vmax.f32 %v1569_v19, %v1570_v5  ;;  %v1606_v48 = vmax.f32 %v1604_v11, %v1605_v28  ;;  %v1611_v62 = vmax.f32 %v1609_v49, %v1610_v33  ;;  %v1744_v19 = vsub.s32 %v1741_v39, %v2233_v26 }
 0x341   : > { %v1616_v43 = vsel %vm1542_vm6, %v1566_v63, -inf  ;;  %v1667_v45 = vcombine.low %v1563_v40, %v1566_v63  ;;  %v1601_v47 = vmax.f32 %v1599_v0, %v1600_v57  ;;  %v1624_v1 = vmax.f32 %v1587_v60, %v1594_v3  ;;  %v1720_v56 = vpop.permute.xlu1 %1719 }
 0x342   : > { %v1572_v18 = vrot.slane %v1571_v36, 1  ;;  %v1617_v7 = vrot.slane %v1616_v43, 4  ;;  %v1607_v35 = vrot.slane %v1606_v48, 1  ;;  %v1612_v2 = vrot.slane %v1611_v62, 2 }
 0x343   : > { %v1681_v54 = vrot.slane %v1667_v45, %v2240_v31  ;;  %1731 = vperm.xlu0 %1940, %v1710_v13   ;;  %v1739_v25 = vsub.s32 %v1736_v58, %v2233_v26  ;;  %v1755_v11 = vadd.s32 4294967252, %v2687_v52  ;;  %v1751_v15 = vsub.s32 %v1748_v14, %v2233_v26 }
 0x344   : > { %v1573_v29 = vmax.f32 %v1571_v36, %v1572_v18  ;;  %v1618_v22 = vmax.f32 %v1616_v43, %v1617_v7  ;;  %v1613_v23 = vmax.f32 %v1611_v62, %v1612_v2  ;;  %v1608_v32 = vmax.f32 %v1606_v48, %v1607_v35 }
 0x345   : > { %v1682_v37 = vcombine.low %v1674_v30, %v1681_v54  ;;  %v1723_v27 = vpop.permute.xlu1 %1722  ;;  %v1762_v53 = vadd.s32 4294967244, %v2687_v52  ;;  %v1740_v5 = vrot.slane %v1714_v55, %v1739_v25  ;;  %v1769_v8 = vadd.s32 4294967236, %v2687_v52 }
 0x346   : > { %v1619_v16 = vrot.slane %v1618_v22, 2  ;;  %v1623_v6 = vmax.f32 %v1573_v29, %v1580_v4  ;;  %v1614_v31 = vrot.slane %v1613_v23, 1  ;;  %v1625_v13 = vmax.f32 %v1601_v47, %v1608_v32 }
 0x347   : > { %1687 = vperm.xlu1 %1939, %v1682_v37   ;;  %v1758_v46 = vsub.s32 %v1755_v11, %v2233_v26  ;;  %v1689_v42 = vadd.s32 4294967292, %v2687_v52  ;;  %v1694_v63 = vadd.s32 4294967284, %v2687_v52  ;;  %v1752_v24 = vrot.slane %v1720_v56, %v1751_v15 }
 0x348   : > { %v1620_v41 = vmax.f32 %v1618_v22, %v1619_v16  ;;  %v1631_v21 = vsel %vm1330_vm2, %v1624_v1, %v1623_v6  ;;  %v1615_v50 = vmax.f32 %v1613_v23, %v1614_v31  ;;  %v1765_v51 = vsub.s32 %v1762_v53, %v2233_v26 }
 0x349   : > { %v1632_v20 = vsel %vm1332_vm3, %v1625_v13, %v1631_v21  ;;  %v1776_v36 = vadd.s32 4294967228, %v2687_v52  ;;  %v1772_v0 = vsub.s32 %v1769_v8, %v2233_v26  ;;  %v1729_v48 = vpop.permute.xlu1 %1728  ;;  %v1759_v43 = vrot.slane %v1723_v27, %v1758_v46 }
 0x34a   : > { %v1621_v9 = vrot.slane %v1620_v41, 1  ;;  %v1692_v45 = vsub.s32 %v1689_v42, %v2233_v26  ;;  %v1697_v10 = vsub.s32 %v1694_v63, %v2233_v26  ;;  %v1783_v18 = vadd.s32 4294967220, %v2687_v52 }
 0x34b   : > { %1734 = vperm.xlu1 %1939, %v1711_v59   ;;  %v1717_v59 = vpop.permute.xlu0 %1716  ;;  %v1779_v7 = vsub.s32 %v1776_v36, %v2233_v26  ;;  %v1773_v54 = vrot.slane %v1729_v48, %v1772_v0 }
 0x34c   : > { %v1622_v38 = vmax.f32 %v1620_v41, %v1621_v9  ;;  %v1786_v22 = vsub.s32 %v1783_v18, %v2233_v26 }
 0x34e   : > { %v1626_v44 = vmax.f32 %v1615_v50, %v1622_v38 }
 0x34f   : > { %v1726_v40 = vpop.permute.xlu0 %1725 }
 0x350   : > { %v1633_v17 = vsel %vm1334_vm4, %v1626_v44, %v1632_v20  ;;  %v1766_v62 = vrot.slane %v1726_v40, %v1765_v51 }
 0x351   : > { %v1637_v34 = vrot.slane %v1633_v17, %v2693_v12  ;;  %v1745_v12 = vrot.slane %v1717_v59, %v1744_v19 }
 0x353   : > { %1640 = vst.msk [vmem:[%s2859_s28] sm:$0x1] %vm1639_vm7, %v1637_v34  ;;  %v1747_v28 = vsel %vm1746_vm8, %v1745_v12, %v1740_v5 }
 0x354   : > { %v1754_v33 = vsel %vm1753_vm9, %v1752_v24, %v1747_v28 }
 0x355   : > { %v1761_v35 = vsel %vm1760_vm10, %v1759_v43, %v1754_v33 }
 0x356   : > { %v1768_v57 = vsel %vm1767_vm11, %v1766_v62, %v1761_v35 }
 0x357   : > { %v1775_v3 = vsel %vm1774_vm14, %v1773_v54, %v1768_v57 }
 0x3be   : > { %v1685_v49 = vpop.permute.xlu0 %1684 }
 0x3bf   : > { %v1693_v29 = vrot.slane %v1685_v49, %v1692_v45 }
 0x3c2   : > { %v1732_v30 = vpop.permute.xlu0 %1731 }
 0x3c3   : > { %v1780_v52 = vrot.slane %v1732_v30, %v1779_v7 }
 0x3c5   : > { %v1782_v16 = vsel %vm1781_vm15, %v1780_v52, %v1775_v3 }
 0x3c6   : > { %v1688_v61 = vpop.permute.xlu1 %1687 }
 0x3c7   : > { %v1698_v2 = vrot.slane %v1688_v61, %v1697_v10 }
 0x3c9   : > { %v1700_v37 = vsel %vm1699_vm12, %v1698_v2, %v1693_v29 }
 0x3ca   : > { %v1735_v4 = vpop.permute.xlu1 %1734  ;;  %1703 = vst.msk [vmem:[%s2859_s28] sm:$0x1] %vm1702_vm13, %v1700_v37 }
 0x3cb   : > { %v1787_v23 = vrot.slane %v1735_v4, %v1786_v22 }
 0x3cd   : > { %v1789_v26 = vsel %vm1788_vm0, %v1787_v23, %v1782_v16 }
 0x3ce   : > { %1792 = vst.msk [vmem:[%s2859_s28] sm:$0x1] %vm1791_vm1, %v1789_v26 }
 0x3cf   : > { %1984 = shalt.err (!%p1981_p2)
}
 0x3d0   : > { %s1985_s20 = scalar_lea.hbm %s2888_s5, 16  ;;  %s1989_s23 = scalar_lea.hbm %s2934_s1, 32 }
 0x3d1   : > { %p1986_p4 = scmp.ne.s32.totalorder %s2888_s5, %s1985_s20  ;;  %p1990_p9 = scmp.lt.u32.totalorder %s2888_s5, %s2934_s1 }
 0x3d2   : > { %p1991_p1 = scmp.lt.u32.totalorder %s1989_s23, %s1985_s20  ;;  %p1993_p6 = scmp.lt.u32.totalorder %s1985_s20, %s2888_s5 }
 0x3d3   : > { %p1987_p5 = pnand %p1986_p4, %p2941_p11 }
 0x3d4   : > { %p1992_p3 = por %p1991_p1, %p1990_p9 }
 0x3d5   : > { %p1988_p7 = pneg %p1987_p5 }
 0x3d6   : > { %p1994_p12 = por %p1993_p6, %p1992_p3 }
 0x3d8   : > { %p1995_p13 = pnand %p1994_p12, %p1988_p7 }
 0x3da   : > { %1998 = shalt.err (!%p1995_p13)
}
 0x3db   : > { %1886 = dma.vmem_to_hbm [thread:$0]  (%p2941_p11), %s2890_s2, 16, %s2888_s5, %s1794_s10  }
 0x3dc PF: > { %s1818_s30 = sand.u32 1, %s2025_s6   ;;  %p2942_p8 = scmp.ne.s32.totalorder %s2939_s19, 0 }
 0x3dd   : > { %p2943_p10 = scmp.ge.s32.totalorder %s2037_s9, 2  ;;  %s1819_s25 = scalar_lea.sflag [#allocation4], %s1818_s30 }
 0x3df   : > { %p1893_p0 = pnand %p2943_p10, %p2942_p8 }
 0x3e1   : > { %2020 = dma.done.wait (!%p1893_p0), %s1819_s25, 16  }
 0x3e2   : > { %2022 = vsyncadd (!%p1893_p0), %s1819_s25, 4294967280  ;;  %p14_p2 = scmp.ge.s32.totalorder %s2085_s12, 4   ;;  %s2944_s6 = smov %s2029_s7 }
 0x3e3   : > { %s2945_s7 = smov %s2033_s8  ;;  %s2946_s8 = smov %s2097_s15 }
 0x3e4   : > { %s2947_s9 = smov %s2085_s12  ;;  %16 = sbr.rel (!%p14_p2) target bundleno = 5 (0x5), region = 69 }
 0x3eb   :  { %1823 = vsyncpa [#allocation3], 1 }
 0x3ec   :  { %1825 = vsyncpa [#allocation3 + $0x1], 1 }
 0x3ed   :  { %1826 = vsyncpa [#allocation4], 1 }
 0x3ee   :  { %1828 = vsyncpa [#allocation4 + $0x1], 1 }

</bundles_post_ra>
